<compile_context>
chip_gen: v7x
topology: tpu7x:2x2x1
jax: 0.10.0
libtpu: 0.0.40
codegen_flags: <defaults>
</compile_context>

<pallas_src>
import jax
import jax.numpy as jnp
from jax.experimental import pallas as pl
from jax.experimental.pallas import tpu as pltpu

MAX_BP_ITER = 3
BN_EPS = 1e-5
NEG_SLOPE = 0.0  # nn.LeakyReLU(inTraining == False) with inTraining=True -> slope 0.0
LANE = 128


def _bn(x, gamma, beta):
    """Training-mode BatchNorm1d over the node axis (axis 0), biased variance.

    Single XLU reduction: one axis-0 mean over the [N, 2*W] slab [x | x*x];
    var = E[x^2] - E[x]^2 (clamped at 0), rsqrt on the EUP.
    """
    w = x.shape[1]
    stats = jnp.mean(jnp.concatenate([x, x * x], axis=1), axis=0, keepdims=True)
    mean = stats[:, :w]
    var = jnp.maximum(stats[:, w:] - mean * mean, 0.0)
    return (x - mean) * jax.lax.rsqrt(var + BN_EPS) * gamma + beta


def decoder_kernel(x_ref, a_ref,
                   w_in_ref, b_in_ref, g1_ref, be1_ref,
                   w_x_ref,
                   b_gcn_ref, b_rz_ref, b_in2_ref, b_hn_ref,
                   gc_ref, bc_ref, go_ref, bo_ref,
                   out_ref):
    f32 = jnp.float32
    bf16 = jnp.bfloat16
    ge = b_gcn_ref.shape[1]  # G*E = 128 (lane-dense gate width)

    # ---- hoisted loop-invariant loads (vreg/VMEM resident across the loop) ----
    a_hat = a_ref[...]        # bf16 [N, N]
    w_x = w_x_ref[...]        # bf16 [G*E, 7*G*E] = [gcn | gcnh_r|z|n | ir | iz | in2]
    b_gcn = b_gcn_ref[...]
    b_rz = b_rz_ref[...]      # [1, 2*G*E] = [b_ir+b_hr+b_gcn@Wh_r | b_iz+b_hz+b_gcn@Wh_z]
    b_in2 = b_in2_ref[...]
    b_hn = b_hn_ref[...]      # [1, G*E]   = b_hn + b_gcn@Wh_n
    gc = gc_ref[...]
    bc = bc_ref[...]

    # ---- inputLayer: Linear -> LeakyReLU(0.0) -> BatchNorm1d ----
    x = jnp.dot(x_ref[0].astype(bf16), w_in_ref[...],
                preferred_element_type=f32) + b_in_ref[...]
    x = jnp.where(x > 0, x, NEG_SLOPE * x)
    x = _bn(x, g1_ref[...], be1_ref[...])

    max_x = x

    # ---- BP iterations (static unrolled; 2 MXU ops / iteration) ----
    for _ in range(MAX_BP_ITER):
        # one fused x-side matmul: [N, 7*G*E]
        xs = jnp.dot(x.astype(bf16), w_x, preferred_element_type=f32)
        # one A_hat matmul over the contiguous [x@Wgcn | x@Wgcn@Wh] slab
        agg = jnp.dot(a_hat, xs[:, 0:4 * ge].astype(bf16),
                      preferred_element_type=f32)

        conv = agg[:, 0:ge] + b_gcn                      # GCNConv output (GRU hidden)
        # GRUCell(input=pre_x, hidden=conv); all slices are 128-lane aligned
        rz = jax.nn.sigmoid(xs[:, 4 * ge:6 * ge] + agg[:, ge:3 * ge] + b_rz)
        r = rz[:, 0:ge]
        z = rz[:, ge:2 * ge]
        n = jnp.tanh(xs[:, 6 * ge:7 * ge] + b_in2 + r * (agg[:, 3 * ge:4 * ge] + b_hn))
        h = (1.0 - z) * n + z * conv

        x = _bn(h, gc, bc)                               # outThisCycle BN
        max_x = jnp.maximum(max_x, x)                    # running elementwise max

    # ---- outputLayer BatchNorm1d; lane-dense [N, G*E] store ----
    out_ref[0] = _bn(max_x, go_ref[...], bo_ref[...])


def _pack_gates(w, g, e_out):
    """Expand a shared per-graph weight [E_in, n_gates*E_out] to a packed weight
    [g*E_in, n_gates*g*E_out] for activations with g graphs packed graph-major
    along lanes.  Output columns are gate-major, then graph, then feature, so
    every gate slice in the kernel is a whole-vreg 128-lane block."""
    e_in = w.shape[0]
    n_gates = w.shape[1] // e_out
    w4 = w.reshape(e_in, n_gates, e_out)
    eye = jnp.eye(g, dtype=w.dtype)
    big = jnp.einsum('gh,iko->gikho', eye, w4)           # [g, E_in, n_gates, g, E_out]
    return big.reshape(g * e_in, n_gates * g * e_out)


def decoder_forward(x, a_hat, p):
    b, n, f = x.shape
    e = p["w_in"].shape[1]
    g = max(1, LANE // e)                # graphs packed along lanes per grid step
    # TODO(synk): pad the batch to a multiple of g instead of asserting.
    assert b % g == 0, "batch must be a multiple of graphs_per_block"
    nb = b // g
    ge = g * e
    bf16 = jnp.bfloat16

    # --- GCN -> GRU hidden-projection reassociation (once, in f32) ---
    #   conv @ W_h = A_hat @ (x @ (W_gcn @ W_h)) + b_gcn @ W_h
    w_h = jnp.concatenate([p["w_hr"], p["w_hz"], p["w_hn"]], axis=1)     # [E, 3E]
    w_gcnh = p["w_gcn"] @ w_h                                            # [E, 3E]
    b_gcnh = p["b_gcn"] @ w_h                                            # [1, 3E]

    # per-graph fused x-side weight, gate order [gcn | gcnh_r|z|n | ir | iz | in2]
    w_x1 = jnp.concatenate([p["w_gcn"], w_gcnh,
                            p["w_ir"], p["w_iz"], p["w_in2"]], axis=1)   # [E, 7E]

    # pre-fused GRU biases (absorb the reassociated b_gcn @ W_h terms)
    b_r = p["b_ir"] + p["b_hr"] + b_gcnh[:, 0:e]
    b_z = p["b_iz"] + p["b_hz"] + b_gcnh[:, e:2 * e]
    b_n = p["b_hn"] + b_gcnh[:, 2 * e:3 * e]

    # --- pack g graphs along lanes (shared weights -> block-diag, gate-major) ---
    w_in_p = _pack_gates(p["w_in"], g, e).astype(bf16)   # [g*F, g*E]
    w_x_p = _pack_gates(w_x1, g, e).astype(bf16)         # [g*E, 7*g*E]
    tl = lambda v: jnp.tile(v, (1, g))
    b_in_p, g1_p, be1_p = tl(p["b_in"]), tl(p["g1"]), tl(p["be1"])
    b_gcn_p = tl(p["b_gcn"])
    b_rz_p = jnp.concatenate([tl(b_r), tl(b_z)], axis=1)  # [1, 2*g*E]
    b_in2_p, b_hn_p = tl(p["b_in2"]), tl(b_n)
    gc_p, bc_p = tl(p["gc"]), tl(p["bc"])
    go_p, bo_p = tl(p["go"]), tl(p["bo"])

    # x: [B, N, F] -> [B/g, N, g*F] (graphs packed graph-major along lanes)
    x_p = x.reshape(nb, g, n, f).transpose(0, 2, 1, 3).reshape(nb, n, g * f)
    a_hat_bf = a_hat.astype(bf16)        # shared Tanner graph for the whole batch

    args = (x_p, a_hat_bf,
            w_in_p, b_in_p, g1_p, be1_p,
            w_x_p,
            b_gcn_p, b_rz_p, b_in2_p, b_hn_p,
            gc_p, bc_p, go_p, bo_p)

    # TODO(synk): for large N, tile a_hat over the grid (two-pass cross-tile BN
    # stats) or replace the dense A_hat matmul with an SMEM neighbor-index
    # gather (the graph is ~3 nnz/row), instead of a fully resident [N, N].
    const2 = lambda arr: pl.BlockSpec(arr.shape, lambda i: (0, 0))
    in_specs = [pl.BlockSpec((1, n, g * f), lambda i: (i, 0, 0))] + [
        const2(a) for a in args[1:]]

    out_p = pl.pallas_call(
        decoder_kernel,
        out_shape=jax.ShapeDtypeStruct((nb, n, ge), jnp.float32),
        grid=(nb,),
        in_specs=in_specs,
        out_specs=pl.BlockSpec((1, n, ge), lambda i: (i, 0, 0)),
        compiler_params=pltpu.CompilerParams(
            dimension_semantics=("parallel",)),
    )(*args)

    # unpack lanes back to [B, N, E]
    return out_p.reshape(nb, n, g, e).transpose(0, 2, 1, 3).reshape(b, n, e)


def gcn_norm_dense(edge_index, num_nodes):
    """Dense sym-normalized adjacency with self loops (torch_geometric gcn_norm)."""
    loops = jnp.arange(num_nodes, dtype=edge_index.dtype)
    src = jnp.concatenate([edge_index[0], loops])
    dst = jnp.concatenate([edge_index[1], loops])
    deg = jnp.zeros((num_nodes,), jnp.float32).at[dst].add(1.0)
    dinv = jax.lax.rsqrt(deg)  # deg >= 1 because of self loops
    vals = dinv[src] * dinv[dst]
    # aggregation: out[dst] += vals * x_lin[src]  =>  A_hat[dst, src] = vals
    return jnp.zeros((num_nodes, num_nodes), jnp.float32).at[dst, src].add(vals)


def reference_single(x, a_hat, p):
    """Pure-JAX reference, faithful to the PyTorch forward (one graph)."""
    def bn(v, g, b):
        m = v.mean(0, keepdims=True)
        var = ((v - m) ** 2).mean(0, keepdims=True)
        return (v - m) / jnp.sqrt(var + BN_EPS) * g + b

    x = x @ p["w_in"] + p["b_in"]
    x = jnp.where(x > 0, x, NEG_SLOPE * x)
    x = bn(x, p["g1"], p["be1"])
    mx = x
    for _ in range(MAX_BP_ITER):
        pre = x
        conv = a_hat @ (x @ p["w_gcn"]) + p["b_gcn"]
        r = jax.nn.sigmoid(pre @ p["w_ir"] + p["b_ir"] + conv @ p["w_hr"] + p["b_hr"])
        z = jax.nn.sigmoid(pre @ p["w_iz"] + p["b_iz"] + conv @ p["w_hz"] + p["b_hz"])
        nn_ = jnp.tanh(pre @ p["w_in2"] + p["b_in2"] + r * (conv @ p["w_hn"] + p["b_hn"]))
        h = (1.0 - z) * nn_ + z * conv
        x = bn(h, p["gc"], p["bc"])
        mx = jnp.maximum(mx, x)
    return bn(mx, p["go"], p["bo"])


def reference(x, a_hat, p):
    return jax.vmap(lambda xb: reference_single(xb, a_hat, p))(x)


def make_params(key, feat_dim, emb_dim):
    ks = jax.random.split(key, 20)
    f32 = jnp.float32
    nrm = lambda k, s, scale=0.3: (scale * jax.random.normal(k, s)).astype(f32)
    return {
        "w_in": nrm(ks[0], (feat_dim, emb_dim)),
        "b_in": nrm(ks[1], (1, emb_dim), 0.1),
        "g1": 1.0 + nrm(ks[2], (1, emb_dim), 0.1),
        "be1": nrm(ks[3], (1, emb_dim), 0.1),
        "w_gcn": nrm(ks[4], (emb_dim, emb_dim)),
        "b_gcn": nrm(ks[5], (1, emb_dim), 0.1),
        # GRUCell gate weights, stored [in, out] per gate (r, z, n)
        "w_ir": nrm(ks[6], (emb_dim, emb_dim)),
        "w_iz": nrm(ks[7], (emb_dim, emb_dim)),
        "w_in2": nrm(ks[8], (emb_dim, emb_dim)),
        "w_hr": nrm(ks[9], (emb_dim, emb_dim)),
        "w_hz": nrm(ks[10], (emb_dim, emb_dim)),
        "w_hn": nrm(ks[11], (emb_dim, emb_dim)),
        "b_ir": nrm(ks[12], (1, emb_dim), 0.1),
        "b_iz": nrm(ks[13], (1, emb_dim), 0.1),
        "b_in2": nrm(ks[14], (1, emb_dim), 0.1),
        "b_hr": nrm(ks[15], (1, emb_dim), 0.1),
        "b_hz": nrm(ks[16], (1, emb_dim), 0.1),
        "b_hn": nrm(ks[17], (1, emb_dim), 0.1),
        "gc": 1.0 + nrm(ks[18], (1, emb_dim), 0.1),
        "bc": nrm(ks[19], (1, emb_dim), 0.1),
        "go": jnp.ones((1, emb_dim), f32) * 1.05,
        "bo": jnp.full((1, emb_dim), 0.02, f32),
    }


if __name__ == "__main__":
    BATCH, N_NODES, FEAT_DIM, EMB_DIM = 8, 16, 8, 32

    key = jax.random.PRNGKey(0)
    kx, kp = jax.random.split(key)

    # B codewords over the same Tanner graph: node features [B, N, F]
    x = jax.random.normal(kx, (BATCH, N_NODES, FEAT_DIM), dtype=jnp.float32)

    # edge_index [2, E]: ring graph (both directions), deterministic
    idx = jnp.arange(N_NODES, dtype=jnp.int32)
    nxt = (idx + 1) % N_NODES
    edge_index = jnp.stack([jnp.concatenate([idx, nxt]),
                            jnp.concatenate([nxt, idx])], axis=0)

    a_hat = gcn_norm_dense(edge_index, N_NODES)
    params = make_params(kp, FEAT_DIM, EMB_DIM)

    out = jax.block_until_ready(decoder_forward(x, a_hat, params))
    ref = jax.block_until_ready(reference(x, a_hat, params))
    assert out.shape == (BATCH, N_NODES, EMB_DIM)

    # bf16 single-pass MXU operands + the GCN->GRU hidden-projection
    # reassociation + single-pass BN variance change rounding vs. the
    # default-precision f32 reference; over 3 recurrent batch-normalized
    # iterations the elementwise drift is a few 1e-2, so compare at 1e-1.
    err = float(jnp.max(jnp.abs(out - ref)))
    assert jnp.allclose(out, ref, atol=1e-1, rtol=1e-1), f"mismatch: max abs err {err}"

    print("KERNEL_OK")
</pallas_src>

<mosaic_0001>
module attributes {stable_mosaic.version = 11 : i64} {
  func.func @decoder_kernel(%arg0: i32, %arg1: memref<1x16x32xf32, #tpu.memory_space<vmem>>, %arg2: memref<16x16xbf16, #tpu.memory_space<vmem>>, %arg3: memref<32x128xbf16, #tpu.memory_space<vmem>>, %arg4: memref<1x128xf32, #tpu.memory_space<vmem>>, %arg5: memref<1x128xf32, #tpu.memory_space<vmem>>, %arg6: memref<1x128xf32, #tpu.memory_space<vmem>>, %arg7: memref<128x896xbf16, #tpu.memory_space<vmem>>, %arg8: memref<1x128xf32, #tpu.memory_space<vmem>>, %arg9: memref<1x256xf32, #tpu.memory_space<vmem>>, %arg10: memref<1x128xf32, #tpu.memory_space<vmem>>, %arg11: memref<1x128xf32, #tpu.memory_space<vmem>>, %arg12: memref<1x128xf32, #tpu.memory_space<vmem>>, %arg13: memref<1x128xf32, #tpu.memory_space<vmem>>, %arg14: memref<1x128xf32, #tpu.memory_space<vmem>>, %arg15: memref<1x128xf32, #tpu.memory_space<vmem>>, %arg16: memref<1x16x128xf32, #tpu.memory_space<vmem>>) attributes {dimension_semantics = [#tpu.dimension_semantics<parallel>], iteration_bounds = array<i64: 2>, scalar_prefetch = 0 : i64, scratch_operands = 0 : i64, tpu.core_type = #tpu.core_type<tc>, window_params = [{transform_indices = @transform_0, window_bounds = array<i64: 1, 16, 32>}, {pipeline_mode = #tpu.pipeline_mode<synchronous>, transform_indices = @transform_1, window_bounds = array<i64: 16, 16>}, {pipeline_mode = #tpu.pipeline_mode<synchronous>, transform_indices = @transform_2, window_bounds = array<i64: 32, 128>}, {pipeline_mode = #tpu.pipeline_mode<synchronous>, transform_indices = @transform_3, window_bounds = array<i64: 1, 128>}, {pipeline_mode = #tpu.pipeline_mode<synchronous>, transform_indices = @transform_4, window_bounds = array<i64: 1, 128>}, {pipeline_mode = #tpu.pipeline_mode<synchronous>, transform_indices = @transform_5, window_bounds = array<i64: 1, 128>}, {pipeline_mode = #tpu.pipeline_mode<synchronous>, transform_indices = @transform_6, window_bounds = array<i64: 128, 896>}, {pipeline_mode = #tpu.pipeline_mode<synchronous>, transform_indices = @transform_7, window_bounds = array<i64: 1, 128>}, {pipeline_mode = #tpu.pipeline_mode<synchronous>, transform_indices = @transform_8, window_bounds = array<i64: 1, 256>}, {pipeline_mode = #tpu.pipeline_mode<synchronous>, transform_indices = @transform_9, window_bounds = array<i64: 1, 128>}, {pipeline_mode = #tpu.pipeline_mode<synchronous>, transform_indices = @transform_10, window_bounds = array<i64: 1, 128>}, {pipeline_mode = #tpu.pipeline_mode<synchronous>, transform_indices = @transform_11, window_bounds = array<i64: 1, 128>}, {pipeline_mode = #tpu.pipeline_mode<synchronous>, transform_indices = @transform_12, window_bounds = array<i64: 1, 128>}, {pipeline_mode = #tpu.pipeline_mode<synchronous>, transform_indices = @transform_13, window_bounds = array<i64: 1, 128>}, {pipeline_mode = #tpu.pipeline_mode<synchronous>, transform_indices = @transform_14, window_bounds = array<i64: 1, 128>}, {transform_indices = @transform_15, window_bounds = array<i64: 1, 16, 128>}]} {
    %c0 = arith.constant 0 : index
    %c0_0 = arith.constant 0 : index
    %0 = vector.load %arg2[%c0, %c0_0] : memref<16x16xbf16, #tpu.memory_space<vmem>>, vector<16x16xbf16>
    %c0_1 = arith.constant 0 : index
    %c0_2 = arith.constant 0 : index
    %1 = vector.load %arg7[%c0_1, %c0_2] : memref<128x896xbf16, #tpu.memory_space<vmem>>, vector<128x896xbf16>
    %c0_3 = arith.constant 0 : index
    %c0_4 = arith.constant 0 : index
    %2 = vector.load %arg8[%c0_3, %c0_4] : memref<1x128xf32, #tpu.memory_space<vmem>>, vector<1x128xf32>
    %c0_5 = arith.constant 0 : index
    %c0_6 = arith.constant 0 : index
    %3 = vector.load %arg9[%c0_5, %c0_6] : memref<1x256xf32, #tpu.memory_space<vmem>>, vector<1x256xf32>
    %c0_7 = arith.constant 0 : index
    %c0_8 = arith.constant 0 : index
    %4 = vector.load %arg10[%c0_7, %c0_8] : memref<1x128xf32, #tpu.memory_space<vmem>>, vector<1x128xf32>
    %c0_9 = arith.constant 0 : index
    %c0_10 = arith.constant 0 : index
    %5 = vector.load %arg11[%c0_9, %c0_10] : memref<1x128xf32, #tpu.memory_space<vmem>>, vector<1x128xf32>
    %c0_11 = arith.constant 0 : index
    %c0_12 = arith.constant 0 : index
    %6 = vector.load %arg12[%c0_11, %c0_12] : memref<1x128xf32, #tpu.memory_space<vmem>>, vector<1x128xf32>
    %c0_13 = arith.constant 0 : index
    %c0_14 = arith.constant 0 : index
    %7 = vector.load %arg13[%c0_13, %c0_14] : memref<1x128xf32, #tpu.memory_space<vmem>>, vector<1x128xf32>
    %c0_15 = arith.constant 0 : index
    %c0_16 = arith.constant 0 : index
    %c0_17 = arith.constant 0 : index
    %8 = vector.load %arg1[%c0_15, %c0_16, %c0_17] : memref<1x16x32xf32, #tpu.memory_space<vmem>>, vector<1x16x32xf32>
    %9 = vector.shape_cast %8 : vector<1x16x32xf32> to vector<16x32xf32>
    %10 = arith.truncf %9 : vector<16x32xf32> to vector<16x32xbf16>
    %c0_18 = arith.constant 0 : index
    %c0_19 = arith.constant 0 : index
    %11 = vector.load %arg3[%c0_18, %c0_19] : memref<32x128xbf16, #tpu.memory_space<vmem>>, vector<32x128xbf16>
    %cst = arith.constant dense<0.000000e+00> : vector<16x128xf32>
    %12 = tpu.matmul %10, %11, %cst {dimension_numbers = #tpu.dot_dimension_numbers<[1], [0], [0], [1], [0, 0, 1, 1], [], []>} : vector<16x32xbf16>, vector<32x128xbf16>, vector<16x128xf32> -> vector<16x128xf32>
    %c0_20 = arith.constant 0 : index
    %c0_21 = arith.constant 0 : index
    %13 = vector.load %arg4[%c0_20, %c0_21] : memref<1x128xf32, #tpu.memory_space<vmem>>, vector<1x128xf32>
    %14 = vector.broadcast %13 : vector<1x128xf32> to vector<16x128xf32>
    %15 = arith.addf %12, %14 : vector<16x128xf32>
    %cst_22 = arith.constant 0.000000e+00 : f32
    %16 = vector.broadcast %cst_22 : f32 to vector<16x128xf32>
    %17 = arith.cmpf ogt, %15, %16 : vector<16x128xf32>
    %cst_23 = arith.constant 0.000000e+00 : f32
    %18 = vector.broadcast %cst_23 : f32 to vector<16x128xf32>
    %19 = arith.mulf %18, %15 : vector<16x128xf32>
    %20 = arith.select %17, %15, %19 : vector<16x128xi1>, vector<16x128xf32>
    %c0_24 = arith.constant 0 : index
    %c0_25 = arith.constant 0 : index
    %21 = vector.load %arg5[%c0_24, %c0_25] : memref<1x128xf32, #tpu.memory_space<vmem>>, vector<1x128xf32>
    %c0_26 = arith.constant 0 : index
    %c0_27 = arith.constant 0 : index
    %22 = vector.load %arg6[%c0_26, %c0_27] : memref<1x128xf32, #tpu.memory_space<vmem>>, vector<1x128xf32>
    %23 = arith.mulf %20, %20 : vector<16x128xf32>
    %24 = tpu.concatenate %20, %23 in 1 : vector<16x128xf32>, vector<16x128xf32> -> vector<16x256xf32>
    %cst_28 = arith.constant dense<0.000000e+00> : vector<256xf32>
    %25 = vector.multi_reduction <add>, %24, %cst_28 [0] : vector<16x256xf32> to vector<256xf32>
    %26 = vector.shape_cast %25 : vector<256xf32> to vector<1x256xf32>
    %cst_29 = arith.constant 1.600000e+01 : f32
    %27 = vector.broadcast %cst_29 : f32 to vector<1x256xf32>
    %28 = arith.divf %26, %27 : vector<1x256xf32>
    %29 = vector.extract_strided_slice %28 {offsets = [0, 0], sizes = [1, 128], strides = [1, 1]} : vector<1x256xf32> to vector<1x128xf32>
    %30 = vector.extract_strided_slice %28 {offsets = [0, 128], sizes = [1, 128], strides = [1, 1]} : vector<1x256xf32> to vector<1x128xf32>
    %31 = arith.mulf %29, %29 : vector<1x128xf32>
    %32 = arith.subf %30, %31 : vector<1x128xf32>
    %cst_30 = arith.constant 0.000000e+00 : f32
    %33 = vector.broadcast %cst_30 : f32 to vector<1x128xf32>
    %34 = arith.maximumf %32, %33 : vector<1x128xf32>
    %35 = vector.broadcast %29 : vector<1x128xf32> to vector<16x128xf32>
    %36 = arith.subf %20, %35 : vector<16x128xf32>
    %cst_31 = arith.constant 9.99999974E-6 : f32
    %37 = vector.broadcast %cst_31 : f32 to vector<1x128xf32>
    %38 = arith.addf %34, %37 : vector<1x128xf32>
    %39 = math.rsqrt %38 : vector<1x128xf32>
    %40 = vector.broadcast %39 : vector<1x128xf32> to vector<16x128xf32>
    %41 = arith.mulf %36, %40 : vector<16x128xf32>
    %42 = vector.broadcast %21 : vector<1x128xf32> to vector<16x128xf32>
    %43 = arith.mulf %41, %42 : vector<16x128xf32>
    %44 = vector.broadcast %22 : vector<1x128xf32> to vector<16x128xf32>
    %45 = arith.addf %43, %44 : vector<16x128xf32>
    %46 = arith.truncf %45 : vector<16x128xf32> to vector<16x128xbf16>
    %cst_32 = arith.constant dense<0.000000e+00> : vector<16x896xf32>
    %47 = tpu.matmul %46, %1, %cst_32 {dimension_numbers = #tpu.dot_dimension_numbers<[1], [0], [0], [1], [0, 0, 1, 1], [], []>} : vector<16x128xbf16>, vector<128x896xbf16>, vector<16x896xf32> -> vector<16x896xf32>
    %48 = vector.extract_strided_slice %47 {offsets = [0, 0], sizes = [16, 512], strides = [1, 1]} : vector<16x896xf32> to vector<16x512xf32>
    %49 = arith.truncf %48 : vector<16x512xf32> to vector<16x512xbf16>
    %cst_33 = arith.constant dense<0.000000e+00> : vector<16x512xf32>
    %50 = tpu.matmul %0, %49, %cst_33 {dimension_numbers = #tpu.dot_dimension_numbers<[1], [0], [0], [1], [0, 0, 1, 1], [], []>} : vector<16x16xbf16>, vector<16x512xbf16>, vector<16x512xf32> -> vector<16x512xf32>
    %51 = vector.extract_strided_slice %50 {offsets = [0, 0], sizes = [16, 128], strides = [1, 1]} : vector<16x512xf32> to vector<16x128xf32>
    %52 = vector.broadcast %2 : vector<1x128xf32> to vector<16x128xf32>
    %53 = arith.addf %51, %52 : vector<16x128xf32>
    %54 = vector.extract_strided_slice %47 {offsets = [0, 512], sizes = [16, 256], strides = [1, 1]} : vector<16x896xf32> to vector<16x256xf32>
    %55 = vector.extract_strided_slice %50 {offsets = [0, 128], sizes = [16, 256], strides = [1, 1]} : vector<16x512xf32> to vector<16x256xf32>
    %56 = arith.addf %54, %55 : vector<16x256xf32>
    %57 = vector.broadcast %3 : vector<1x256xf32> to vector<16x256xf32>
    %58 = arith.addf %56, %57 : vector<16x256xf32>
    %59 = arith.negf %58 : vector<16x256xf32>
    %60 = math.exp %59 : vector<16x256xf32>
    %cst_34 = arith.constant 1.000000e+00 : f32
    %61 = vector.broadcast %cst_34 : f32 to vector<16x256xf32>
    %62 = arith.addf %61, %60 : vector<16x256xf32>
    %63 = arith.divf %61, %62 : vector<16x256xf32>
    %64 = vector.extract_strided_slice %63 {offsets = [0, 0], sizes = [16, 128], strides = [1, 1]} : vector<16x256xf32> to vector<16x128xf32>
    %65 = vector.extract_strided_slice %63 {offsets = [0, 128], sizes = [16, 128], strides = [1, 1]} : vector<16x256xf32> to vector<16x128xf32>
    %66 = vector.extract_strided_slice %47 {offsets = [0, 768], sizes = [16, 128], strides = [1, 1]} : vector<16x896xf32> to vector<16x128xf32>
    %67 = vector.broadcast %4 : vector<1x128xf32> to vector<16x128xf32>
    %68 = arith.addf %66, %67 : vector<16x128xf32>
    %69 = vector.extract_strided_slice %50 {offsets = [0, 384], sizes = [16, 128], strides = [1, 1]} : vector<16x512xf32> to vector<16x128xf32>
    %70 = vector.broadcast %5 : vector<1x128xf32> to vector<16x128xf32>
    %71 = arith.addf %69, %70 : vector<16x128xf32>
    %72 = arith.mulf %64, %71 : vector<16x128xf32>
    %73 = arith.addf %68, %72 : vector<16x128xf32>
    %74 = math.tanh %73 : vector<16x128xf32>
    %cst_35 = arith.constant 1.000000e+00 : f32
    %75 = vector.broadcast %cst_35 : f32 to vector<16x128xf32>
    %76 = arith.subf %75, %65 : vector<16x128xf32>
    %77 = arith.mulf %76, %74 : vector<16x128xf32>
    %78 = arith.mulf %65, %53 : vector<16x128xf32>
    %79 = arith.addf %77, %78 : vector<16x128xf32>
    %80 = arith.mulf %79, %79 : vector<16x128xf32>
    %81 = tpu.concatenate %79, %80 in 1 : vector<16x128xf32>, vector<16x128xf32> -> vector<16x256xf32>
    %cst_36 = arith.constant dense<0.000000e+00> : vector<256xf32>
    %82 = vector.multi_reduction <add>, %81, %cst_36 [0] : vector<16x256xf32> to vector<256xf32>
    %83 = vector.shape_cast %82 : vector<256xf32> to vector<1x256xf32>
    %cst_37 = arith.constant 1.600000e+01 : f32
    %84 = vector.broadcast %cst_37 : f32 to vector<1x256xf32>
    %85 = arith.divf %83, %84 : vector<1x256xf32>
    %86 = vector.extract_strided_slice %85 {offsets = [0, 0], sizes = [1, 128], strides = [1, 1]} : vector<1x256xf32> to vector<1x128xf32>
    %87 = vector.extract_strided_slice %85 {offsets = [0, 128], sizes = [1, 128], strides = [1, 1]} : vector<1x256xf32> to vector<1x128xf32>
    %88 = arith.mulf %86, %86 : vector<1x128xf32>
    %89 = arith.subf %87, %88 : vector<1x128xf32>
    %cst_38 = arith.constant 0.000000e+00 : f32
    %90 = vector.broadcast %cst_38 : f32 to vector<1x128xf32>
    %91 = arith.maximumf %89, %90 : vector<1x128xf32>
    %92 = vector.broadcast %86 : vector<1x128xf32> to vector<16x128xf32>
    %93 = arith.subf %79, %92 : vector<16x128xf32>
    %cst_39 = arith.constant 9.99999974E-6 : f32
    %94 = vector.broadcast %cst_39 : f32 to vector<1x128xf32>
    %95 = arith.addf %91, %94 : vector<1x128xf32>
    %96 = math.rsqrt %95 : vector<1x128xf32>
    %97 = vector.broadcast %96 : vector<1x128xf32> to vector<16x128xf32>
    %98 = arith.mulf %93, %97 : vector<16x128xf32>
    %99 = vector.broadcast %6 : vector<1x128xf32> to vector<16x128xf32>
    %100 = arith.mulf %98, %99 : vector<16x128xf32>
    %101 = vector.broadcast %7 : vector<1x128xf32> to vector<16x128xf32>
    %102 = arith.addf %100, %101 : vector<16x128xf32>
    %103 = arith.maximumf %45, %102 : vector<16x128xf32>
    %104 = arith.truncf %102 : vector<16x128xf32> to vector<16x128xbf16>
    %cst_40 = arith.constant dense<0.000000e+00> : vector<16x896xf32>
    %105 = tpu.matmul %104, %1, %cst_40 {dimension_numbers = #tpu.dot_dimension_numbers<[1], [0], [0], [1], [0, 0, 1, 1], [], []>} : vector<16x128xbf16>, vector<128x896xbf16>, vector<16x896xf32> -> vector<16x896xf32>
    %106 = vector.extract_strided_slice %105 {offsets = [0, 0], sizes = [16, 512], strides = [1, 1]} : vector<16x896xf32> to vector<16x512xf32>
    %107 = arith.truncf %106 : vector<16x512xf32> to vector<16x512xbf16>
    %cst_41 = arith.constant dense<0.000000e+00> : vector<16x512xf32>
    %108 = tpu.matmul %0, %107, %cst_41 {dimension_numbers = #tpu.dot_dimension_numbers<[1], [0], [0], [1], [0, 0, 1, 1], [], []>} : vector<16x16xbf16>, vector<16x512xbf16>, vector<16x512xf32> -> vector<16x512xf32>
    %109 = vector.extract_strided_slice %108 {offsets = [0, 0], sizes = [16, 128], strides = [1, 1]} : vector<16x512xf32> to vector<16x128xf32>
    %110 = vector.broadcast %2 : vector<1x128xf32> to vector<16x128xf32>
    %111 = arith.addf %109, %110 : vector<16x128xf32>
    %112 = vector.extract_strided_slice %105 {offsets = [0, 512], sizes = [16, 256], strides = [1, 1]} : vector<16x896xf32> to vector<16x256xf32>
    %113 = vector.extract_strided_slice %108 {offsets = [0, 128], sizes = [16, 256], strides = [1, 1]} : vector<16x512xf32> to vector<16x256xf32>
    %114 = arith.addf %112, %113 : vector<16x256xf32>
    %115 = vector.broadcast %3 : vector<1x256xf32> to vector<16x256xf32>
    %116 = arith.addf %114, %115 : vector<16x256xf32>
    %117 = arith.negf %116 : vector<16x256xf32>
    %118 = math.exp %117 : vector<16x256xf32>
    %cst_42 = arith.constant 1.000000e+00 : f32
    %119 = vector.broadcast %cst_42 : f32 to vector<16x256xf32>
    %120 = arith.addf %119, %118 : vector<16x256xf32>
    %121 = arith.divf %119, %120 : vector<16x256xf32>
    %122 = vector.extract_strided_slice %121 {offsets = [0, 0], sizes = [16, 128], strides = [1, 1]} : vector<16x256xf32> to vector<16x128xf32>
    %123 = vector.extract_strided_slice %121 {offsets = [0, 128], sizes = [16, 128], strides = [1, 1]} : vector<16x256xf32> to vector<16x128xf32>
    %124 = vector.extract_strided_slice %105 {offsets = [0, 768], sizes = [16, 128], strides = [1, 1]} : vector<16x896xf32> to vector<16x128xf32>
    %125 = vector.broadcast %4 : vector<1x128xf32> to vector<16x128xf32>
    %126 = arith.addf %124, %125 : vector<16x128xf32>
    %127 = vector.extract_strided_slice %108 {offsets = [0, 384], sizes = [16, 128], strides = [1, 1]} : vector<16x512xf32> to vector<16x128xf32>
    %128 = vector.broadcast %5 : vector<1x128xf32> to vector<16x128xf32>
    %129 = arith.addf %127, %128 : vector<16x128xf32>
    %130 = arith.mulf %122, %129 : vector<16x128xf32>
    %131 = arith.addf %126, %130 : vector<16x128xf32>
    %132 = math.tanh %131 : vector<16x128xf32>
    %cst_43 = arith.constant 1.000000e+00 : f32
    %133 = vector.broadcast %cst_43 : f32 to vector<16x128xf32>
    %134 = arith.subf %133, %123 : vector<16x128xf32>
    %135 = arith.mulf %134, %132 : vector<16x128xf32>
    %136 = arith.mulf %123, %111 : vector<16x128xf32>
    %137 = arith.addf %135, %136 : vector<16x128xf32>
    %138 = arith.mulf %137, %137 : vector<16x128xf32>
    %139 = tpu.concatenate %137, %138 in 1 : vector<16x128xf32>, vector<16x128xf32> -> vector<16x256xf32>
    %cst_44 = arith.constant dense<0.000000e+00> : vector<256xf32>
    %140 = vector.multi_reduction <add>, %139, %cst_44 [0] : vector<16x256xf32> to vector<256xf32>
    %141 = vector.shape_cast %140 : vector<256xf32> to vector<1x256xf32>
    %cst_45 = arith.constant 1.600000e+01 : f32
    %142 = vector.broadcast %cst_45 : f32 to vector<1x256xf32>
    %143 = arith.divf %141, %142 : vector<1x256xf32>
    %144 = vector.extract_strided_slice %143 {offsets = [0, 0], sizes = [1, 128], strides = [1, 1]} : vector<1x256xf32> to vector<1x128xf32>
    %145 = vector.extract_strided_slice %143 {offsets = [0, 128], sizes = [1, 128], strides = [1, 1]} : vector<1x256xf32> to vector<1x128xf32>
    %146 = arith.mulf %144, %144 : vector<1x128xf32>
    %147 = arith.subf %145, %146 : vector<1x128xf32>
    %cst_46 = arith.constant 0.000000e+00 : f32
    %148 = vector.broadcast %cst_46 : f32 to vector<1x128xf32>
    %149 = arith.maximumf %147, %148 : vector<1x128xf32>
    %150 = vector.broadcast %144 : vector<1x128xf32> to vector<16x128xf32>
    %151 = arith.subf %137, %150 : vector<16x128xf32>
    %cst_47 = arith.constant 9.99999974E-6 : f32
    %152 = vector.broadcast %cst_47 : f32 to vector<1x128xf32>
    %153 = arith.addf %149, %152 : vector<1x128xf32>
    %154 = math.rsqrt %153 : vector<1x128xf32>
    %155 = vector.broadcast %154 : vector<1x128xf32> to vector<16x128xf32>
    %156 = arith.mulf %151, %155 : vector<16x128xf32>
    %157 = vector.broadcast %6 : vector<1x128xf32> to vector<16x128xf32>
    %158 = arith.mulf %156, %157 : vector<16x128xf32>
    %159 = vector.broadcast %7 : vector<1x128xf32> to vector<16x128xf32>
    %160 = arith.addf %158, %159 : vector<16x128xf32>
    %161 = arith.maximumf %103, %160 : vector<16x128xf32>
    %162 = arith.truncf %160 : vector<16x128xf32> to vector<16x128xbf16>
    %cst_48 = arith.constant dense<0.000000e+00> : vector<16x896xf32>
    %163 = tpu.matmul %162, %1, %cst_48 {dimension_numbers = #tpu.dot_dimension_numbers<[1], [0], [0], [1], [0, 0, 1, 1], [], []>} : vector<16x128xbf16>, vector<128x896xbf16>, vector<16x896xf32> -> vector<16x896xf32>
    %164 = vector.extract_strided_slice %163 {offsets = [0, 0], sizes = [16, 512], strides = [1, 1]} : vector<16x896xf32> to vector<16x512xf32>
    %165 = arith.truncf %164 : vector<16x512xf32> to vector<16x512xbf16>
    %cst_49 = arith.constant dense<0.000000e+00> : vector<16x512xf32>
    %166 = tpu.matmul %0, %165, %cst_49 {dimension_numbers = #tpu.dot_dimension_numbers<[1], [0], [0], [1], [0, 0, 1, 1], [], []>} : vector<16x16xbf16>, vector<16x512xbf16>, vector<16x512xf32> -> vector<16x512xf32>
    %167 = vector.extract_strided_slice %166 {offsets = [0, 0], sizes = [16, 128], strides = [1, 1]} : vector<16x512xf32> to vector<16x128xf32>
    %168 = vector.broadcast %2 : vector<1x128xf32> to vector<16x128xf32>
    %169 = arith.addf %167, %168 : vector<16x128xf32>
    %170 = vector.extract_strided_slice %163 {offsets = [0, 512], sizes = [16, 256], strides = [1, 1]} : vector<16x896xf32> to vector<16x256xf32>
    %171 = vector.extract_strided_slice %166 {offsets = [0, 128], sizes = [16, 256], strides = [1, 1]} : vector<16x512xf32> to vector<16x256xf32>
    %172 = arith.addf %170, %171 : vector<16x256xf32>
    %173 = vector.broadcast %3 : vector<1x256xf32> to vector<16x256xf32>
    %174 = arith.addf %172, %173 : vector<16x256xf32>
    %175 = arith.negf %174 : vector<16x256xf32>
    %176 = math.exp %175 : vector<16x256xf32>
    %cst_50 = arith.constant 1.000000e+00 : f32
    %177 = vector.broadcast %cst_50 : f32 to vector<16x256xf32>
    %178 = arith.addf %177, %176 : vector<16x256xf32>
    %179 = arith.divf %177, %178 : vector<16x256xf32>
    %180 = vector.extract_strided_slice %179 {offsets = [0, 0], sizes = [16, 128], strides = [1, 1]} : vector<16x256xf32> to vector<16x128xf32>
    %181 = vector.extract_strided_slice %179 {offsets = [0, 128], sizes = [16, 128], strides = [1, 1]} : vector<16x256xf32> to vector<16x128xf32>
    %182 = vector.extract_strided_slice %163 {offsets = [0, 768], sizes = [16, 128], strides = [1, 1]} : vector<16x896xf32> to vector<16x128xf32>
    %183 = vector.broadcast %4 : vector<1x128xf32> to vector<16x128xf32>
    %184 = arith.addf %182, %183 : vector<16x128xf32>
    %185 = vector.extract_strided_slice %166 {offsets = [0, 384], sizes = [16, 128], strides = [1, 1]} : vector<16x512xf32> to vector<16x128xf32>
    %186 = vector.broadcast %5 : vector<1x128xf32> to vector<16x128xf32>
    %187 = arith.addf %185, %186 : vector<16x128xf32>
    %188 = arith.mulf %180, %187 : vector<16x128xf32>
    %189 = arith.addf %184, %188 : vector<16x128xf32>
    %190 = math.tanh %189 : vector<16x128xf32>
    %cst_51 = arith.constant 1.000000e+00 : f32
    %191 = vector.broadcast %cst_51 : f32 to vector<16x128xf32>
    %192 = arith.subf %191, %181 : vector<16x128xf32>
    %193 = arith.mulf %192, %190 : vector<16x128xf32>
    %194 = arith.mulf %181, %169 : vector<16x128xf32>
    %195 = arith.addf %193, %194 : vector<16x128xf32>
    %196 = arith.mulf %195, %195 : vector<16x128xf32>
    %197 = tpu.concatenate %195, %196 in 1 : vector<16x128xf32>, vector<16x128xf32> -> vector<16x256xf32>
    %cst_52 = arith.constant dense<0.000000e+00> : vector<256xf32>
    %198 = vector.multi_reduction <add>, %197, %cst_52 [0] : vector<16x256xf32> to vector<256xf32>
    %199 = vector.shape_cast %198 : vector<256xf32> to vector<1x256xf32>
    %cst_53 = arith.constant 1.600000e+01 : f32
    %200 = vector.broadcast %cst_53 : f32 to vector<1x256xf32>
    %201 = arith.divf %199, %200 : vector<1x256xf32>
    %202 = vector.extract_strided_slice %201 {offsets = [0, 0], sizes = [1, 128], strides = [1, 1]} : vector<1x256xf32> to vector<1x128xf32>
    %203 = vector.extract_strided_slice %201 {offsets = [0, 128], sizes = [1, 128], strides = [1, 1]} : vector<1x256xf32> to vector<1x128xf32>
    %204 = arith.mulf %202, %202 : vector<1x128xf32>
    %205 = arith.subf %203, %204 : vector<1x128xf32>
    %cst_54 = arith.constant 0.000000e+00 : f32
    %206 = vector.broadcast %cst_54 : f32 to vector<1x128xf32>
    %207 = arith.maximumf %205, %206 : vector<1x128xf32>
    %208 = vector.broadcast %202 : vector<1x128xf32> to vector<16x128xf32>
    %209 = arith.subf %195, %208 : vector<16x128xf32>
    %cst_55 = arith.constant 9.99999974E-6 : f32
    %210 = vector.broadcast %cst_55 : f32 to vector<1x128xf32>
    %211 = arith.addf %207, %210 : vector<1x128xf32>
    %212 = math.rsqrt %211 : vector<1x128xf32>
    %213 = vector.broadcast %212 : vector<1x128xf32> to vector<16x128xf32>
    %214 = arith.mulf %209, %213 : vector<16x128xf32>
    %215 = vector.broadcast %6 : vector<1x128xf32> to vector<16x128xf32>
    %216 = arith.mulf %214, %215 : vector<16x128xf32>
    %217 = vector.broadcast %7 : vector<1x128xf32> to vector<16x128xf32>
    %218 = arith.addf %216, %217 : vector<16x128xf32>
    %219 = arith.maximumf %161, %218 : vector<16x128xf32>
    %c0_56 = arith.constant 0 : index
    %c0_57 = arith.constant 0 : index
    %220 = vector.load %arg14[%c0_56, %c0_57] : memref<1x128xf32, #tpu.memory_space<vmem>>, vector<1x128xf32>
    %c0_58 = arith.constant 0 : index
    %c0_59 = arith.constant 0 : index
    %221 = vector.load %arg15[%c0_58, %c0_59] : memref<1x128xf32, #tpu.memory_space<vmem>>, vector<1x128xf32>
    %222 = arith.mulf %219, %219 : vector<16x128xf32>
    %223 = tpu.concatenate %219, %222 in 1 : vector<16x128xf32>, vector<16x128xf32> -> vector<16x256xf32>
    %cst_60 = arith.constant dense<0.000000e+00> : vector<256xf32>
    %224 = vector.multi_reduction <add>, %223, %cst_60 [0] : vector<16x256xf32> to vector<256xf32>
    %225 = vector.shape_cast %224 : vector<256xf32> to vector<1x256xf32>
    %cst_61 = arith.constant 1.600000e+01 : f32
    %226 = vector.broadcast %cst_61 : f32 to vector<1x256xf32>
    %227 = arith.divf %225, %226 : vector<1x256xf32>
    %228 = vector.extract_strided_slice %227 {offsets = [0, 0], sizes = [1, 128], strides = [1, 1]} : vector<1x256xf32> to vector<1x128xf32>
    %229 = vector.extract_strided_slice %227 {offsets = [0, 128], sizes = [1, 128], strides = [1, 1]} : vector<1x256xf32> to vector<1x128xf32>
    %230 = arith.mulf %228, %228 : vector<1x128xf32>
    %231 = arith.subf %229, %230 : vector<1x128xf32>
    %cst_62 = arith.constant 0.000000e+00 : f32
    %232 = vector.broadcast %cst_62 : f32 to vector<1x128xf32>
    %233 = arith.maximumf %231, %232 : vector<1x128xf32>
    %234 = vector.broadcast %228 : vector<1x128xf32> to vector<16x128xf32>
    %235 = arith.subf %219, %234 : vector<16x128xf32>
    %cst_63 = arith.constant 9.99999974E-6 : f32
    %236 = vector.broadcast %cst_63 : f32 to vector<1x128xf32>
    %237 = arith.addf %233, %236 : vector<1x128xf32>
    %238 = math.rsqrt %237 : vector<1x128xf32>
    %239 = vector.broadcast %238 : vector<1x128xf32> to vector<16x128xf32>
    %240 = arith.mulf %235, %239 : vector<16x128xf32>
    %241 = vector.broadcast %220 : vector<1x128xf32> to vector<16x128xf32>
    %242 = arith.mulf %240, %241 : vector<16x128xf32>
    %243 = vector.broadcast %221 : vector<1x128xf32> to vector<16x128xf32>
    %244 = arith.addf %242, %243 : vector<16x128xf32>
    %c0_64 = arith.constant 0 : index
    %c0_65 = arith.constant 0 : index
    %c0_66 = arith.constant 0 : index
    %245 = vector.load %arg16[%c0_64, %c0_65, %c0_66] : memref<1x16x128xf32, #tpu.memory_space<vmem>>, vector<1x16x128xf32>
    %246 = vector.shape_cast %245 : vector<1x16x128xf32> to vector<16x128xf32>
    %247 = vector.shape_cast %244 : vector<16x128xf32> to vector<1x16x128xf32>
    tpu.vector_store %arg16[%c0_64, %c0_65, %c0_66], %247 {strides = array<i32>} : memref<1x16x128xf32, #tpu.memory_space<vmem>>, vector<1x16x128xf32>,
    return
  }
  func.func @transform_0(%arg0: i32) -> (i32, i32, i32) {
    %c0_i32 = arith.constant 0 : i32
    %c0_i32_0 = arith.constant 0 : i32
    %c0_i32_1 = arith.constant 0 : i32
    return %arg0, %c0_i32, %c0_i32_0 : i32, i32, i32
  }
  func.func @transform_1(%arg0: i32) -> (i32, i32) {
    %c0_i32 = arith.constant 0 : i32
    %c0_i32_0 = arith.constant 0 : i32
    %c0_i32_1 = arith.constant 0 : i32
    return %c0_i32, %c0_i32_0 : i32, i32
  }
  func.func @transform_2(%arg0: i32) -> (i32, i32) {
    %c0_i32 = arith.constant 0 : i32
    %c0_i32_0 = arith.constant 0 : i32
    %c0_i32_1 = arith.constant 0 : i32
    return %c0_i32, %c0_i32_0 : i32, i32
  }
  func.func @transform_3(%arg0: i32) -> (i32, i32) {
    %c0_i32 = arith.constant 0 : i32
    %c0_i32_0 = arith.constant 0 : i32
    %c0_i32_1 = arith.constant 0 : i32
    return %c0_i32, %c0_i32_0 : i32, i32
  }
  func.func @transform_4(%arg0: i32) -> (i32, i32) {
    %c0_i32 = arith.constant 0 : i32
    %c0_i32_0 = arith.constant 0 : i32
    %c0_i32_1 = arith.constant 0 : i32
    return %c0_i32, %c0_i32_0 : i32, i32
  }
  func.func @transform_5(%arg0: i32) -> (i32, i32) {
    %c0_i32 = arith.constant 0 : i32
    %c0_i32_0 = arith.constant 0 : i32
    %c0_i32_1 = arith.constant 0 : i32
    return %c0_i32, %c0_i32_0 : i32, i32
  }
  func.func @transform_6(%arg0: i32) -> (i32, i32) {
    %c0_i32 = arith.constant 0 : i32
    %c0_i32_0 = arith.constant 0 : i32
    %c0_i32_1 = arith.constant 0 : i32
    return %c0_i32, %c0_i32_0 : i32, i32
  }
  func.func @transform_7(%arg0: i32) -> (i32, i32) {
    %c0_i32 = arith.constant 0 : i32
    %c0_i32_0 = arith.constant 0 : i32
    %c0_i32_1 = arith.constant 0 : i32
    return %c0_i32, %c0_i32_0 : i32, i32
  }
  func.func @transform_8(%arg0: i32) -> (i32, i32) {
    %c0_i32 = arith.constant 0 : i32
    %c0_i32_0 = arith.constant 0 : i32
    %c0_i32_1 = arith.constant 0 : i32
    return %c0_i32, %c0_i32_0 : i32, i32
  }
  func.func @transform_9(%arg0: i32) -> (i32, i32) {
    %c0_i32 = arith.constant 0 : i32
    %c0_i32_0 = arith.constant 0 : i32
    %c0_i32_1 = arith.constant 0 : i32
    return %c0_i32, %c0_i32_0 : i32, i32
  }
  func.func @transform_10(%arg0: i32) -> (i32, i32) {
    %c0_i32 = arith.constant 0 : i32
    %c0_i32_0 = arith.constant 0 : i32
    %c0_i32_1 = arith.constant 0 : i32
    return %c0_i32, %c0_i32_0 : i32, i32
  }
  func.func @transform_11(%arg0: i32) -> (i32, i32) {
    %c0_i32 = arith.constant 0 : i32
    %c0_i32_0 = arith.constant 0 : i32
    %c0_i32_1 = arith.constant 0 : i32
    return %c0_i32, %c0_i32_0 : i32, i32
  }
  func.func @transform_12(%arg0: i32) -> (i32, i32) {
    %c0_i32 = arith.constant 0 : i32
    %c0_i32_0 = arith.constant 0 : i32
    %c0_i32_1 = arith.constant 0 : i32
    return %c0_i32, %c0_i32_0 : i32, i32
  }
  func.func @transform_13(%arg0: i32) -> (i32, i32) {
    %c0_i32 = arith.constant 0 : i32
    %c0_i32_0 = arith.constant 0 : i32
    %c0_i32_1 = arith.constant 0 : i32
    return %c0_i32, %c0_i32_0 : i32, i32
  }
  func.func @transform_14(%arg0: i32) -> (i32, i32) {
    %c0_i32 = arith.constant 0 : i32
    %c0_i32_0 = arith.constant 0 : i32
    %c0_i32_1 = arith.constant 0 : i32
    return %c0_i32, %c0_i32_0 : i32, i32
  }
  func.func @transform_15(%arg0: i32) -> (i32, i32, i32) {
    %c0_i32 = arith.constant 0 : i32
    %c0_i32_0 = arith.constant 0 : i32
    %c0_i32_1 = arith.constant 0 : i32
    return %arg0, %c0_i32, %c0_i32_0 : i32, i32, i32
  }
}

</mosaic_0001>

<bundles_post_ra>
// kernel: tpu_custom_call.1
= control target key start
LH: loop header
LB: loop body
LE: loop exit
PB: predicated region body
PF: predicated region fallthrough
CT: control target
= control target key end

     0   :  { %s3750_s0 = inlined_call_operand.hbm [shape: f32[2,16,32], index: 0, kind: input, shape index: {}]   ;;  %s3751_s1 = inlined_call_operand.hbm [shape: bf16[16,16], index: 1, kind: input, shape index: {}]   ;;  %s3752_s2 = inlined_call_operand.hbm [shape: bf16[32,128], index: 2, kind: input, shape index: {}]   ;;  %s3753_s3 = inlined_call_operand.vmem [shape: f32[1,128], index: 3, kind: input, shape index: {}]   ;;  %s3754_s4 = inlined_call_operand.vmem [shape: f32[1,128], index: 4, kind: input, shape index: {}]   ;;  %s3755_s5 = inlined_call_operand.vmem [shape: f32[1,128], index: 5, kind: input, shape index: {}]   ;;  %s3756_s6 = inlined_call_operand.hbm [shape: bf16[128,896], index: 6, kind: input, shape index: {}]   ;;  %s3757_s7 = inlined_call_operand.vmem [shape: f32[1,128], index: 7, kind: input, shape index: {}]   ;;  %s3758_s8 = inlined_call_operand.vmem [shape: f32[1,256], index: 8, kind: input, shape index: {}]   ;;  %s3759_s9 = inlined_call_operand.vmem [shape: f32[1,128], index: 9, kind: input, shape index: {}]   ;;  %s3760_s10 = inlined_call_operand.vmem [shape: f32[1,128], index: 10, kind: input, shape index: {}]   ;;  %s3761_s11 = inlined_call_operand.vmem [shape: f32[1,128], index: 11, kind: input, shape index: {}]   ;;  %s3762_s12 = inlined_call_operand.vmem [shape: f32[1,128], index: 12, kind: input, shape index: {}]   ;;  %s3763_s13 = inlined_call_operand.vmem [shape: f32[1,128], index: 13, kind: input, shape index: {}]   ;;  %s3764_s14 = inlined_call_operand.vmem [shape: f32[1,128], index: 14, kind: input, shape index: {}]   ;;  %s3765_s15 = inlined_call_operand.hbm [shape: f32[2,16,128], index: 15, kind: output, shape index: {}]  }
   0x1   :  { %3815 = sst [smem:[#allocation45_spill]] %s3759_s9 }
   0x2   :  { %3816 = sst [smem:[#allocation46_spill]] %s3760_s10 }
   0x3   :  { %3817 = sst [smem:[#allocation47_spill]] %s3761_s11 }
   0x4   :  { %3818 = sst [smem:[#allocation48_spill]] %s3762_s12 }
   0x5   :  { %3819 = sst [smem:[#allocation49_spill]] %s3763_s13 }
   0x6   :  { %3820 = sst [smem:[#allocation50_spill]] %s3764_s14 }
   0x7   :  { %3821 = sst [smem:[#allocation51_spill]] %s3765_s15 }
   0x8   :  { %20 = vsyncpa [#allocation3], 0 }
   0x9   :  { %22 = vsyncpa [#allocation3 + $0x1], 0 }
   0xa   :  { %23 = vsyncpa [#allocation6], 0 }
   0xb   :  { %24 = vsyncpa [#allocation9], 0 }
   0xc   :  { %25 = vsyncpa [#allocation4], 0 }
   0xd   :  { %27 = vsyncpa [#allocation4 + $0x1], 0  ;;  %s3027_s18 = smov 0   ;;  %s3029_s19 = smov 0  }
   0xe   :  { %s3031_s20 = smov 0   ;;  %s3033_s21 = smov 0  }
   0xf LB: > { %3822 = sst [smem:[#allocation15_spill]] %s2917_s18  ;;  %s3048_s22 = sadd.s32 4294967295, %s2929_s21   ;;  %s2929_s21 = sphi %s3033_s21, %s3910_s21   ;;  %s2925_s20 = sphi %s3031_s20, %s3909_s20   ;;  %s2921_s19 = sphi %s3029_s19, %s3908_s19   ;;  %s2917_s18 = sphi %s3027_s18, %s3907_s18  }
  0x10   : > { %s2292_s23 = sadd.s32 4294967294, %s2929_s21   ;;  %p53_p0 = scmp.ne.s32.totalorder %s2921_s19, %s2917_s18 }
  0x11   : > { %p3769_p1 = scmp.eq.s32.totalorder %s3048_s22, 0  ;;  %p377_p3 = scmp.eq.s32.totalorder %s2292_s23, 1 }
  0x12   : > { %p2293_p5 = scmp.ge.s32.totalorder %s2929_s21, 1  ;;  %p384_p7 = scmp.lt.s32.totalorder %s2929_s21, 3 }
  0x13   : > { %p3057_p4 = por %p3769_p1, %p53_p0  ;;  %p3062_p6 = por %p377_p3, %p53_p0 }
  0x14   : > { %p3067_p8 = pnand %p2293_p5, %p384_p7  ;;  %s2931_s27 = smov [#allocation5]  }
  0x15   : > { %s3823_s24 = scalar_select %p3057_p4, 1, 0 }
  0x16   : > { %s3824_s25 = scalar_select %p3062_p6, 1, 0 }
  0x17   : > { %s3826_s26 = scalar_select %p3067_p8, 1, 0 }
  0x18   : > { %3825 = sst [smem:[#allocation16_spill]] %s3824_s25  ;;  %s396_s28 = sshll.u32 %s2931_s27, 4  ;;  %s3071_s28 = int_to_ptr.vmem [resolvable:$true] %s396_s28 }
  0x19   : > { %p2516_p9 = pneg %p3067_p8  ;;  %s2932_s30 = smov [#allocation7]  }
  0x1a   : > { %s409_s16 = sshll.u32 %s2932_s30, 4  ;;  %s2933_s17 = smov [#allocation8]   ;;  %s3082_s16 = int_to_ptr.vmem [resolvable:$true] %s409_s16 }
  0x1b   : > { %p3078_p11 = pnand %p2516_p9, %p3769_p1  ;;  %s3084_s23 = sshll.u32 %s2933_s17, 4  ;;  %s432_s23 = int_to_ptr.vmem [resolvable:$true] %s3084_s23 }
  0x1c   : > { %s2741_s18 = scalar_lea.hbm %s3751_s1, 128 }
  0x1d   : > { %p2742_p12 = scmp.ne.s32.totalorder %s3751_s1, %s2741_s18  ;;  %p3094_p13 = pneg %p3078_p11 }
  0x1e   : > { %p2748_p5 = scmp.lt.u32.totalorder %s2741_s18, %s3751_s1 }
  0x1f   : > { %p2744_p0 = pnand %p3094_p13, %p2742_p12 }
  0x21   : > { %p2745_p3 = pneg %p2744_p0 }
  0x23   : > { %p2750_p7 = pnand %p2748_p5, %p2745_p3 }
  0x25   : > { %2753 = shalt.err (!%p2750_p7)
}
  0x26   : > { %s2754_s14 = scalar_lea.vmem %s3071_s28, 128  ;;  %p2762_p2 = scmp.lt.s32.totalorder %s3071_s28, %s3071_s28 }
  0x27   : > { %p2755_p9 = scmp.ne.s32.totalorder %s3071_s28, %s2754_s14  ;;  %p2763_p6 = scmp.lt.s32.totalorder %s2754_s14, %s2754_s14 }
  0x29   : > { %p2757_p10 = pnand %p2755_p9, %p3094_p13  ;;  %p2764_p12 = por %p2763_p6, %p2762_p2 }
  0x2b   : > { %p2758_p1 = pneg %p2757_p10 }
  0x2d   : > { %p2765_p0 = pnand %p2764_p12, %p2758_p1 }
  0x2f   : > { %2768 = shalt.err (!%p2765_p0)
}
  0x30   : > { %s2934_s15 = smov 64   ;;  %s2935_s18 = smov 4  }
  0x31   : > { %2519 = dma.hbm_to_vmem [thread:$0]  (!%p3078_p11), %s3751_s1, 128, %s3071_s28, [#allocation6], %s2934_s15, %s2934_s15, %s2935_s18  }
  0x32   : > { %s2769_s12 = scalar_lea.hbm %s3752_s2, 256 }
  0x33   : > { %p2770_p2 = scmp.ne.s32.totalorder %s3752_s2, %s2769_s12  ;;  %p2776_p10 = scmp.lt.u32.totalorder %s2769_s12, %s3752_s2 }
  0x35   : > { %p2772_p1 = pnand %p2770_p2, %p3094_p13 }
  0x37   : > { %p2773_p6 = pneg %p2772_p1 }
  0x39   : > { %p2778_p3 = pnand %p2776_p10, %p2773_p6 }
  0x3b   : > { %2781 = shalt.err (!%p2778_p3)
}
  0x3c   : > { %s2782_s28 = scalar_lea.vmem %s3082_s16, 256  ;;  %p2790_p12 = scmp.lt.s32.totalorder %s3082_s16, %s3082_s16 }
  0x3d   : > { %p2783_p5 = scmp.ne.s32.totalorder %s3082_s16, %s2782_s28  ;;  %p2791_p0 = scmp.lt.s32.totalorder %s2782_s28, %s2782_s28 }
  0x3f   : > { %p2785_p7 = pnand %p2783_p5, %p3094_p13  ;;  %p2792_p2 = por %p2791_p0, %p2790_p12 }
  0x41   : > { %p2786_p9 = pneg %p2785_p7 }
  0x43   : > { %p2793_p1 = pnand %p2792_p2, %p2786_p9 }
  0x45   : > { %2796 = shalt.err (!%p2793_p1)
}
  0x46   : > { %2522 = dma.hbm_to_vmem [thread:$0]  (!%p3078_p11), %s3752_s2, 256, %s3082_s16, [#allocation6], %s2934_s15, %s2934_s15, %s2935_s18  }
  0x47   : > { %s2797_s25 = scalar_lea.hbm %s3756_s6, 7168 }
  0x48   : > { %p2798_p6 = scmp.ne.s32.totalorder %s3756_s6, %s2797_s25  ;;  %p2804_p5 = scmp.lt.u32.totalorder %s2797_s25, %s3756_s6 }
  0x4a   : > { %p2800_p10 = pnand %p2798_p6, %p3094_p13 }
  0x4c   : > { %p2801_p3 = pneg %p2800_p10 }
  0x4e   : > { %p2806_p7 = pnand %p2804_p5, %p2801_p3 }
  0x50   : > { %2809 = shalt.err (!%p2806_p7)
}
  0x51   : > { %s2810_s28 = scalar_lea.vmem %s432_s23, 7168  ;;  %p2818_p2 = scmp.lt.s32.totalorder %s432_s23, %s432_s23 }
  0x52   : > { %p2811_p9 = scmp.ne.s32.totalorder %s432_s23, %s2810_s28  ;;  %p2819_p1 = scmp.lt.s32.totalorder %s2810_s28, %s2810_s28 }
  0x54   : > { %p2813_p12 = pnand %p2811_p9, %p3094_p13  ;;  %p2820_p4 = por %p2819_p1, %p2818_p2 }
  0x56   : > { %p2814_p0 = pneg %p2813_p12 }
  0x58   : > { %p2821_p8 = pnand %p2820_p4, %p2814_p0 }
  0x5a   : > { %2824 = shalt.err (!%p2821_p8)
}
  0x5b   : > { %s2936_s16 = smov 448   ;;  %s2937_s13 = smov 28  }
  0x5c   : > { %2525 = dma.hbm_to_vmem [thread:$0]  (!%p3078_p11), %s3756_s6, 7168, %s432_s23, [#allocation9], %s2936_s16, %s2936_s16, %s2937_s13  }
  0x5d   : > { %s3158_s9 = sadd.s32 1, %s2929_s21   ;;  %s40_s11 = sadd.s32 1, %s2925_s20 }
  0x5e   : > { %s37_s10 = ssub.s32 %s2929_s21, %s3158_s9  ;;  %p47_p8 = scmp.ne.s32.totalorder %s2925_s20, %s2921_s19 }
  0x5f   : > { %p38_p4 = scmp.eq.s32.totalorder %s37_s10, 0  ;;  %p48_p13 = scmp.eq.s32.totalorder %s2929_s21, 0 }
  0x60   : > { %p2537_p6 = scmp.lt.s32.totalorder %s2929_s21, 2  ;;  %p3829_p3 = scmp.eq.s32.totalorder %s3048_s22, 1 }
  0x61   : > { %s3168_s12 = scalar_select %p38_p4, %s2925_s20, %s40_s11  }
  0x62   : > { %p49_p10 = por %p48_p13, %p47_p8  ;;  %p3172_p5 = por %p3829_p3, %p47_p8 }
  0x63   : > { %s469_s29 = sand.u32 1, %s2925_s20   ;;  %s2400_s27 = sshll.u32 %s2929_s21, 8 }
  0x64   : > { %s2298_s23 = sshll.u32 %s469_s29, 4  ;;  %s3181_s14 = scalar_lea.hbm %s3750_s0, %s2400_s27 }
  0x65   : > { %s473_s28 = scalar_lea.vmem [#allocation2], %s2298_s23  ;;  %p3183_p11 = pnand %p2537_p6, %p49_p10 }
  0x66   : > { %s480_s16 = sshll.u32 %s473_s28, 4  ;;  %s3189_s15 = scalar_lea.sflag [#allocation3], %s469_s29  ;;  %s3187_s16 = int_to_ptr.vmem [resolvable:$true] %s480_s16 }
  0x67   : > { %s2825_s18 = scalar_lea.hbm %s3181_s14, 256  ;;  %p2827_p9 = pneg %p3183_p11 }
  0x68   : > { %p2826_p7 = scmp.ne.s32.totalorder %s3181_s14, %s2825_s18  ;;  %s2830_s27 = scalar_lea.hbm %s3750_s0, 512 }
  0x69   : > { %p2831_p2 = scmp.lt.u32.totalorder %s3181_s14, %s3750_s0  ;;  %p2832_p1 = scmp.lt.u32.totalorder %s2830_s27, %s2825_s18 }
  0x6a   : > { %p2828_p12 = pnand %p2827_p9, %p2826_p7  ;;  %p2834_p8 = scmp.lt.u32.totalorder %s2825_s18, %s3181_s14 }
  0x6b   : > { %p2833_p4 = por %p2832_p1, %p2831_p2 }
  0x6c   : > { %p2829_p0 = pneg %p2828_p12 }
  0x6d   : > { %p2835_p13 = por %p2834_p8, %p2833_p4 }
  0x6f   : > { %p2836_p6 = pnand %p2835_p13, %p2829_p0 }
  0x71   : > { %2839 = shalt.err (!%p2836_p6)
}
  0x72   : > { %s2840_s29 = scalar_lea.vmem %s3187_s16, 256  ;;  %s2938_s17 = smov [#allocation2]  }
  0x73   : > { %p2841_p10 = scmp.ne.s32.totalorder %s3187_s16, %s2840_s29  ;;  %s2845_s28 = sshll.u32 %s2938_s17, 4  ;;  %s2846_s28 = int_to_ptr.vmem [resolvable:$false] %s2845_s28 }
  0x74   : > { %s2847_s10 = scalar_lea.vmem %s2846_s28, 512  ;;  %p2848_p12 = scmp.lt.s32.totalorder %s3187_s16, %s2846_s28 }
  0x75   : > { %p2843_p3 = pnand %p2841_p10, %p2827_p9  ;;  %p2849_p2 = scmp.lt.s32.totalorder %s2847_s10, %s2840_s29 }
  0x77   : > { %p2844_p7 = pneg %p2843_p3  ;;  %p2850_p1 = por %p2849_p2, %p2848_p12 }
  0x79   : > { %p2851_p4 = pnand %p2850_p1, %p2844_p7 }
  0x7b   : > { %2854 = shalt.err (!%p2851_p4)
}
  0x7c   : > { %s2939_s18 = smov 128   ;;  %s2940_s11 = smov 8  }
  0x7d   : > { %2529 = dma.hbm_to_vmem [thread:$0]  (!%p3183_p11), %s3181_s14, 256, %s3187_s16, %s3189_s15, %s2939_s18, %s2939_s18, %s2940_s11  }
  0x7e   : > { %p3832_p9 = scmp.ne.s32.totalorder %s3826_s26, 0 }
  0x80   : > { %492 = sbr.rel (%p3832_p9) target bundleno = 2057 (0x809), region = 80 }
  0x87   : > { %s3220_s27 = sand.u32 1, %s2921_s19   ;;  %p3833_p0 = scmp.ne.s32.totalorder %s3823_s24, 0 }
  0x88   : > { %s2302_s23 = sshll.u32 %s3220_s27, 4  ;;  %s495_s30 = scalar_lea.sflag [#allocation3], %s3220_s27 }
  0x89   : > { %s498_s29 = scalar_lea.vmem [#allocation2], %s2302_s23 }
  0x8a   : > { %2900 = dma.done.wait (%p3833_p0), %s495_s30, 256  }
  0x8b   : > { %2902 = vsyncadd (%p3833_p0), %s495_s30, 4294967040  ;;  %p3834_p11 = scmp.eq.s32.totalorder %s3048_s22, 0 }
  0x8d   : > { %2904 = dma.done.wait (%p3834_p11), [#allocation6], 384   ;;  %p3835_p8 = pmov %p3834_p11 }
  0x8f   : > { %2906 = vsyncadd (%p3835_p8), [#allocation6], 4294966912  ;;  %p3836_p13 = pmov %p3835_p8 }
  0x90   : > { %p3837_p6 = pmov %p3835_p8 }
  0x91   : > { %2908 = dma.done.wait (%p3836_p13), [#allocation9], 7168  }
  0x92   : > { %2910 = vsyncadd (%p3837_p6), [#allocation9], 4294960128  ;;  %v3782_v0 = vmov 0.0   ;;  %vm2942_vm0 = vmmov 0   ;;  %v2588_v1 = vld [vmem:[#allocation7] sm:$0xff]   ;;  %v2589_v2 = vld [vmem:[#allocation7 + $0x8] sm:$0xff]  }
  0x93   : > { %2432 = vmatprep.subr.bf16.mxu0 %v3782_v0  ;;  %2436 = vmatprep.mubr.msk.bf16.mxu0 %vm2942_vm0, %v3782_v0  ;;  %v630_v3 = vld [vmem:[%s498_s29] sm:$0xff]  ;;  %v631_v4 = vld [vmem:[%s498_s29 + $0x8] sm:$0xff]  ;;  %vm656_vm1 = vcmask 261120   ;;  %v3790_v39 = vmov 0   ;;  %vm1221_vm4 = vcmask 130048   ;;  %s3866_s29 = sld [smem:[#allocation46_spill]] }
  0x94   : > { %2433 = vmatpush3.bf16.msra.mxu0 %v2588_v1  ;;  %v632_v5 = vpack.c.bf16 %v631_v4, %v630_v3  ;;  %v3242_v6 = vld [vmem:[#allocation8 + $0x4] ss:$28 sps:$4 sm:$0xff]   ;;  %v3244_v7 = vld [vmem:[#allocation8 + $0xc] ss:$28 sps:$4 sm:$0xff]   ;;  %v3254_v10 = vld [vmem:[#allocation8 + $0x3c] ss:$28 sps:$4 sm:$0xff]   ;;  %1074 = vmatprep.mubr.bf16.mxu1 %v3790_v39 }
  0x95   : > { %2434 = vmatprep.subr.bf16.mxu0 %v3782_v0  ;;  %v3246_v8 = vld [vmem:[#allocation8 + $0x8] ss:$28 sps:$4 sm:$0xff]   ;;  %v3248_v9 = vld [vmem:[#allocation8] ss:$28 sps:$4 sm:$0xff]   ;;  %1042 = vmatprep.subr.bf16.mxu1 %v3242_v6  ;;  %v3260_v13 = vld [vmem:[#allocation8 + $0x38] ss:$28 sps:$4 sm:$0xff]  }
  0x96   : > { %1043 = vmatpush1.bf16.msra.mxu1 %v3248_v9  ;;  %v3256_v11 = vld [vmem:[#allocation8 + $0x44] ss:$28 sps:$4 sm:$0xff]   ;;  %v3266_v14 = vld [vmem:[#allocation8 + $0x74] ss:$28 sps:$4 sm:$0xff]   ;;  %v3268_v15 = vld [vmem:[#allocation8 + $0x7c] ss:$28 sps:$4 sm:$0xff]  }
  0x97   : > { %v3258_v12 = vld [vmem:[#allocation8 + $0x40] ss:$28 sps:$4 sm:$0xff]   ;;  %1044 = vmatprep.subr.bf16.mxu1 %v3254_v10  ;;  %v3270_v16 = vld [vmem:[#allocation8 + $0x78] ss:$28 sps:$4 sm:$0xff]   ;;  %v3272_v17 = vld [vmem:[#allocation8 + $0x70] ss:$28 sps:$4 sm:$0xff]  }
  0x98   : > { %2435 = vmatpush3.bf16.msra.mxu0 %v2589_v2  ;;  %v3278_v18 = vld [vmem:[#allocation8 + $0xac] ss:$28 sps:$4 sm:$0xff]   ;;  %v3280_v19 = vld [vmem:[#allocation8 + $0xb4] ss:$28 sps:$4 sm:$0xff]   ;;  %v3290_v22 = vld [vmem:[#allocation8 + $0xe4] ss:$28 sps:$4 sm:$0xff]  }
  0x99   : > { %1085 = vmatprep.subr.bf16.mxu0 %v3244_v7  ;;  %v3282_v20 = vld [vmem:[#allocation8 + $0xb0] ss:$28 sps:$4 sm:$0xff]   ;;  %v3284_v21 = vld [vmem:[#allocation8 + $0xa8] ss:$28 sps:$4 sm:$0xff]   ;;  %v3296_v25 = vld [vmem:[#allocation8 + $0xe0] ss:$28 sps:$4 sm:$0xff]  }
  0x9a   : > { %1045 = vmatpush1.bf16.msra.mxu1 %v3260_v13  ;;  %v3292_v23 = vld [vmem:[#allocation8 + $0xec] ss:$28 sps:$4 sm:$0xff]   ;;  %3839 = vst [vmem:[#allocation18_spill] sm:$0xff] %v3296_v25  ;;  %v3302_v26 = vld [vmem:[#allocation8 + $0x11c] ss:$28 sps:$4 sm:$0xff]   ;;  %s3868_s14 = sld [smem:[#allocation45_spill]] }
  0x9b   : > { %2437 = vmatmul.mubr.msk.bf16.vlgmr.msra.gmra.mrb[0].mxu0 %vm656_vm1, %v632_v5  ;;  %1046 = vmatprep.subr.bf16.mxu1 %v3266_v14  ;;  %v3294_v24 = vld [vmem:[#allocation8 + $0xe8] ss:$28 sps:$4 sm:$0xff]   ;;  %3840 = vst [vmem:[#allocation19_spill] sm:$0xff] %v3302_v26  ;;  %v3306_v28 = vld [vmem:[#allocation8 + $0x120] ss:$28 sps:$4 sm:$0xff]   ;;  %s3869_s15 = sld [smem:[#allocation47_spill]] }
  0x9c   : > { %1086 = vmatpush1.bf16.msra.mxu0 %v3246_v8  ;;  %3838 = vst [vmem:[#allocation17_spill] sm:$0xff] %v3294_v24  ;;  %v3304_v27 = vld [vmem:[#allocation8 + $0x124] ss:$28 sps:$4 sm:$0xff]   ;;  %3842 = vst [vmem:[#allocation21_spill] sm:$0xff] %v3306_v28  ;;  %v3308_v29 = vld [vmem:[#allocation8 + $0x118] ss:$28 sps:$4 sm:$0xff]   ;;  %1117 = vmatprep.mubr.bf16.mxu0 %v3790_v39 }
  0x9d   : > { %1087 = vmatprep.subr.bf16.mxu0 %v3256_v11  ;;  %3841 = vst [vmem:[#allocation20_spill] sm:$0xff] %v3304_v27  ;;  %3843 = vst [vmem:[#allocation22_spill] sm:$0xff] %v3308_v29  ;;  %v3314_v30 = vld [vmem:[#allocation8 + $0x154] ss:$28 sps:$4 sm:$0xff]   ;;  %v3316_v31 = vld [vmem:[#allocation8 + $0x15c] ss:$28 sps:$4 sm:$0xff]  }
  0x9e   : > { %1047 = vmatpush1.bf16.msra.mxu1 %v3272_v17  ;;  %3844 = vst [vmem:[#allocation23_spill] sm:$0xff] %v3314_v30  ;;  %3845 = vst [vmem:[#allocation24_spill] sm:$0xff] %v3316_v31  ;;  %v3318_v32 = vld [vmem:[#allocation8 + $0x158] ss:$28 sps:$4 sm:$0xff]   ;;  %v3320_v33 = vld [vmem:[#allocation8 + $0x150] ss:$28 sps:$4 sm:$0xff]  }
  0x9f   : > { %1048 = vmatprep.subr.bf16.mxu1 %v3278_v18  ;;  %3846 = vst [vmem:[#allocation25_spill] sm:$0xff] %v3318_v32  ;;  %3847 = vst [vmem:[#allocation26_spill] sm:$0xff] %v3320_v33  ;;  %v3326_v34 = vld [vmem:[#allocation8 + $0x18c] ss:$28 sps:$4 sm:$0xff]   ;;  %v3328_v35 = vld [vmem:[#allocation8 + $0x194] ss:$28 sps:$4 sm:$0xff]  }
  0xa0   : > { %1088 = vmatpush1.bf16.msra.mxu0 %v3258_v12  ;;  %3848 = vst [vmem:[#allocation27_spill] sm:$0xff] %v3326_v34  ;;  %3849 = vst [vmem:[#allocation28_spill] sm:$0xff] %v3328_v35  ;;  %v3330_v36 = vld [vmem:[#allocation8 + $0x190] ss:$28 sps:$4 sm:$0xff]   ;;  %v3332_v37 = vld [vmem:[#allocation8 + $0x188] ss:$28 sps:$4 sm:$0xff]  }
  0xa1   : > { %1089 = vmatprep.subr.bf16.mxu0 %v3268_v15  ;;  %3850 = vst [vmem:[#allocation29_spill] sm:$0xff] %v3330_v36  ;;  %3851 = vst [vmem:[#allocation30_spill] sm:$0xff] %v3332_v37  ;;  %v3336_v38 = vld [vmem:[#allocation8 + $0x14] ss:$28 sps:$4 sm:$0xff]   ;;  %v2307_v40 = vld [vmem:[%s3753_s3] ss:$0 sm:$0xff] }
  0xa2   : > { %1049 = vmatpush1.bf16.msra.mxu1 %v3284_v21  ;;  %3852 = vst [vmem:[#allocation31_spill] sm:$0xff] %v3336_v38  ;;  %s3870_s10 = sld [smem:[#allocation48_spill]]  ;;  %s3900_s30 = sld [smem:[#allocation49_spill]] }
  0xa3   : > { %1050 = vmatprep.subr.bf16.mxu1 %v3290_v22  ;;  %s556_s24 = scalar_lea.vmem [#allocation10], %s2302_s23  ;;  %s3901_s13 = sld [smem:[#allocation50_spill]] }
  0xa4   : > { %1090 = vmatpush1.bf16.msra.mxu0 %v3270_v16  ;;  %s2190_s26 = sshll.u32 %s556_s24, 4  ;;  %s3902_s28 = sld [smem:[#allocation51_spill]]  ;;  %s3706_s26 = int_to_ptr.vmem [resolvable:$true] %s2190_s26 }
  0xa5   : > { %1091 = vmatprep.subr.bf16.mxu0 %v3280_v19  ;;  %s2855_s23 = scalar_lea.vmem %s3706_s26, 256  ;;  %s2944_s18 = smov [#allocation10]  }
  0xa6   : > { %1051 = vmatpush1.bf16.msra.mxu1 %v3296_v25  ;;  %p2856_p10 = scmp.ne.s32.totalorder %s3706_s26, %s2855_s23  ;;  %s2859_s11 = sshll.u32 %s2944_s18, 4  ;;  %s2860_s11 = int_to_ptr.vmem [resolvable:$false] %s2859_s11 }
  0xa7   : > { %1052 = vmatprep.subr.bf16.mxu1 %v3302_v26  ;;  %p2862_p12 = scmp.lt.s32.totalorder %s3706_s26, %s2860_s11 }
  0xa8   : > { %1092 = vmatpush1.bf16.msra.mxu0 %v3282_v20  ;;  %p2857_p3 = pnand %p2856_p10, %p3172_p5 }
  0xa9   : > { %1093 = vmatprep.subr.bf16.mxu0 %v3292_v23 }
  0xaa   : > { %1053 = vmatpush1.bf16.msra.mxu1 %v3308_v29  ;;  %p2858_p7 = pneg %p2857_p3 }
  0xab   : > { %1054 = vmatprep.subr.bf16.mxu1 %v3314_v30 }
  0xac   : > { %1094 = vmatpush1.bf16.msra.mxu0 %v3294_v24 }
  0xad   : > { %1095 = vmatprep.subr.bf16.mxu0 %v3304_v27 }
  0xae   : > { %1055 = vmatpush1.bf16.msra.mxu1 %v3320_v33 }
  0xaf   : > { %1056 = vmatprep.subr.bf16.mxu1 %v3326_v34 }
  0xb0   : > { %1096 = vmatpush1.bf16.msra.mxu0 %v3306_v28 }
  0xb1   : > { %1097 = vmatprep.subr.bf16.mxu0 %v3316_v31 }
  0xb2   : > { %1057 = vmatpush1.bf16.msra.mxu1 %v3332_v37 }
  0xb3   : > { %1128 = vmatprep.subr.bf16.mxu1 %v3336_v38 }
  0xb4   : > { %1098 = vmatpush1.bf16.msra.mxu0 %v3318_v32 }
  0xb5   : > { %1099 = vmatprep.subr.bf16.mxu0 %v3328_v35 }
  0xb8   : > { %1100 = vmatpush1.bf16.msra.mxu0 %v3330_v36 }
  0xb9   : > { %2440 = vmatprep.subr.bf16.mxu0 %v3782_v0 }
 0x16e   : > { %v694_v41 = vpop.f32.mrb[0].mxu0 }
 0x16f   : > { %v695_v42 = vadd.f32 %v2307_v40, %v694_v41  ;;  %v2438_v43 = vpop.f32.mrb[1].mxu0 }
 0x170   : > { %v697_v44 = vpop.f32.mrb[2].mxu0 }
 0x171   : > { %vm701_vm2 = vcmp.gt.f32.partialorder %v695_v42, 0.0  ;;  %v703_v45 = vmul.f32 0.0, %v695_v42  ;;  %v698_v46 = vadd.f32 %v2307_v40, %v697_v44  ;;  %v2439_v47 = vpop.f32.mrb[3].mxu0 }
 0x172   : > { %v2311_v47 = vld [vmem:[%s3754_s4] ss:$0 sm:$0xff] }
 0x173   : > { %v705_v48 = vsel %vm701_vm2, %v695_v42, %v703_v45  ;;  %vm702_vm3 = vcmp.gt.f32.partialorder %v698_v46, 0.0  ;;  %v704_v49 = vmul.f32 0.0, %v698_v46 }
 0x174   : > { %v709_v51 = vmul.f32 %v705_v48, %v705_v48 }
 0x175   : > { %v706_v50 = vsel %vm702_vm3, %v698_v46, %v704_v49 }
 0x176   : > { %v710_v52 = vmul.f32 %v706_v50, %v706_v50  ;;  %v711_v53 = vadd.f32 %v706_v50, %v705_v48 }
 0x178   : > { %v712_v54 = vrot.slane %v711_v53, 4  ;;  %v718_v55 = vadd.f32 %v710_v52, %v709_v51  ;;  %v2312_v52 = vld [vmem:[%s3755_s5] ss:$0 sm:$0xff] }
 0x17a   : > { %v713_v56 = vadd.f32 %v712_v54, %v711_v53  ;;  %v719_v57 = vrot.slane %v718_v55, 4 }
 0x17c   : > { %v714_v58 = vrot.slane %v713_v56, 2  ;;  %v720_v59 = vadd.f32 %v719_v57, %v718_v55 }
 0x17e   : > { %v715_v60 = vadd.f32 %v714_v58, %v713_v56  ;;  %v721_v61 = vrot.slane %v720_v59, 2  ;;  %v3359_v56 = vld [vmem:[#allocation8 + $0x18] ss:$28 sps:$4 sm:$0xff]   ;;  %v3363_v58 = vld [vmem:[#allocation8 + $0x4c] ss:$28 sps:$4 sm:$0xff]  }
 0x180   : > { %v716_v62 = vrot.slane %v715_v60, 1  ;;  %v722_v63 = vadd.f32 %v721_v61, %v720_v59  ;;  %v3367_v59 = vld [vmem:[#allocation8 + $0x48] ss:$28 sps:$4 sm:$0xff]  }
 0x181   : > { %v3373_v61 = vld [vmem:[#allocation8 + $0x84] ss:$28 sps:$4 sm:$0xff]  }
 0x182   : > { %v717_v1 = vadd.f32 %v716_v62, %v715_v60  ;;  %v723_v2 = vrot.slane %v722_v63, 1  ;;  %v3369_v60 = vld [vmem:[#allocation8 + $0x50] ss:$28 sps:$4 sm:$0xff]   ;;  %v3380_v62 = vld [vmem:[#allocation8 + $0x80] ss:$28 sps:$4 sm:$0xff]  }
 0x184   : > { %v724_v3 = vadd.f32 %v723_v2, %v722_v63  ;;  %v726_v4 = vmul.f32 0.0625, %v717_v1  ;;  %v3382_v63 = vld [vmem:[#allocation8 + $0x88] ss:$28 sps:$4 sm:$0xff]   ;;  %v3386_v1 = vld [vmem:[#allocation8 + $0xbc] ss:$28 sps:$4 sm:$0xff]  }
 0x185   : > { %v3390_v2 = vld [vmem:[#allocation8 + $0xb8] ss:$28 sps:$4 sm:$0xff]  }
 0x186   : > { %v727_v5 = vmul.f32 0.0625, %v724_v3  ;;  %v728_v40 = vmul.f32 %v726_v4, %v726_v4  ;;  %v732_v41 = vsub.f32 %v706_v50, %v726_v4  ;;  %v731_v42 = vsub.f32 %v705_v48, %v726_v4  ;;  %v3357_v50 = vld [vmem:[#allocation8 + $0x10] ss:$28 sps:$4 sm:$0xff]   ;;  %v3392_v3 = vld [vmem:[#allocation8 + $0xc0] ss:$28 sps:$4 sm:$0xff]  }
 0x187   : > { %v3396_v4 = vld [vmem:[#allocation8 + $0xf4] ss:$28 sps:$4 sm:$0xff]  }
 0x188   : > { %v729_v43 = vsub.f32 %v727_v5, %v728_v40  ;;  %v3400_v5 = vld [vmem:[#allocation8 + $0xf0] ss:$28 sps:$4 sm:$0xff]   ;;  %v3402_v40 = vld [vmem:[#allocation8 + $0xf8] ss:$28 sps:$4 sm:$0xff]  }
 0x18a   : > { %v730_v44 = vmax.f32 %v729_v43, 0.0  ;;  %v3412_v43 = vld [vmem:[#allocation8 + $0x130] ss:$28 sps:$4 sm:$0xff]  }
 0x18b   : > { %3855 = vst [vmem:[#allocation34_spill] sm:$0xff] %v3412_v43 }
 0x18c   : > { %v733_v45 = vadd.f32 1e-05, %v730_v44  ;;  %v3416_v44 = vld [vmem:[#allocation8 + $0x164] ss:$28 sps:$4 sm:$0xff]  }
 0x18d   : > { %3856 = vst [vmem:[#allocation35_spill] sm:$0xff] %v3416_v44 }
 0x18e   : > { %2671 = vrsqrt.f32 %v733_v45  ;;  %v3420_v45 = vld [vmem:[#allocation8 + $0x160] ss:$28 sps:$4 sm:$0xff]  }
 0x18f   : > { %3857 = vst [vmem:[#allocation36_spill] sm:$0xff] %v3420_v45 }
 0x198   : > { %v2672_v46 = vpop.eup %2671 }
 0x199   : > { %v736_v49 = vmul.f32 %v2672_v46, %v732_v41  ;;  %v735_v51 = vmul.f32 %v2672_v46, %v731_v42  ;;  %v3406_v41 = vld [vmem:[#allocation8 + $0x12c] ss:$28 sps:$4 sm:$0xff]  }
 0x19a   : > { %v3410_v42 = vld [vmem:[#allocation8 + $0x128] ss:$28 sps:$4 sm:$0xff]  }
 0x19b   : > { %v744_v53 = vmul.f32 %v2311_v47, %v736_v49  ;;  %v743_v54 = vmul.f32 %v2311_v47, %v735_v51  ;;  %v3422_v46 = vld [vmem:[#allocation8 + $0x168] ss:$28 sps:$4 sm:$0xff]   ;;  %v3426_v47 = vld [vmem:[#allocation8 + $0x19c] ss:$28 sps:$4 sm:$0xff]  }
 0x19c   : > { %3858 = vst [vmem:[#allocation37_spill] sm:$0xff] %v3422_v46  ;;  %3859 = vst [vmem:[#allocation38_spill] sm:$0xff] %v3426_v47  ;;  %v3430_v49 = vld [vmem:[#allocation8 + $0x198] ss:$28 sps:$4 sm:$0xff]   ;;  %v3432_v51 = vld [vmem:[#allocation8 + $0x1a0] ss:$28 sps:$4 sm:$0xff]  }
 0x19d   : > { %v3353_v55 = vadd.f32 %v2312_v52, %v743_v54  ;;  %v3355_v48 = vadd.f32 %v2312_v52, %v744_v53  ;;  %3860 = vst [vmem:[#allocation39_spill] sm:$0xff] %v3430_v49  ;;  %3861 = vst [vmem:[#allocation40_spill] sm:$0xff] %v3432_v51 }
 0x19f   : > { %3853 = vst [vmem:[#allocation32_spill] sm:$0xff] %v3353_v55  ;;  %3854 = vst [vmem:[#allocation33_spill] sm:$0xff] %v3355_v48  ;;  %v753_v57 = vpack.c.bf16 %v3355_v48, %v3353_v55 }
 0x1a1   : > { %1075 = vmatmul.mubr.bf16.vlgmr.msra.gmra.mrb[0].mxu1 %v753_v57  ;;  %1118 = vmatmul.mubr.bf16.vlgmr.msra.gmra.mrb[4].mxu0 %v753_v57 }
 0x1a2   : > { %1129 = vmatpush1.bf16.msra.mxu1 %v3357_v50  ;;  %2441 = vmatpush3.bf16.msra.mxu0 %v3359_v56 }
 0x1a3   : > { %1130 = vmatprep.subr.bf16.mxu1 %v3363_v58  ;;  %2442 = vmatprep.subr.bf16.mxu0 %v3782_v0 }
 0x1a4   : > { %1160 = vmatprep.mubr.bf16.mxu1 %v3790_v39  ;;  %2456 = vmatprep.mubr.msk.bf16.mxu0 %vm2942_vm0, %v3782_v0 }
 0x1a6   : > { %1131 = vmatpush1.bf16.msra.mxu1 %v3367_v59  ;;  %2443 = vmatpush3.bf16.msra.mxu0 %v3369_v60 }
 0x1a7   : > { %1132 = vmatprep.subr.bf16.mxu1 %v3373_v61  ;;  %2444 = vmatprep.subr.bf16.mxu0 %v3782_v0 }
 0x1aa   : > { %1133 = vmatpush1.bf16.msra.mxu1 %v3380_v62  ;;  %2445 = vmatpush3.bf16.msra.mxu0 %v3382_v63 }
 0x1ab   : > { %1134 = vmatprep.subr.bf16.mxu1 %v3386_v1  ;;  %2446 = vmatprep.subr.bf16.mxu0 %v3782_v0 }
 0x1ae   : > { %1135 = vmatpush1.bf16.msra.mxu1 %v3390_v2  ;;  %2447 = vmatpush3.bf16.msra.mxu0 %v3392_v3 }
 0x1af   : > { %1136 = vmatprep.subr.bf16.mxu1 %v3396_v4  ;;  %2448 = vmatprep.subr.bf16.mxu0 %v3782_v0 }
 0x1b2   : > { %1137 = vmatpush1.bf16.msra.mxu1 %v3400_v5  ;;  %2449 = vmatpush3.bf16.msra.mxu0 %v3402_v40 }
 0x1b3   : > { %1138 = vmatprep.subr.bf16.mxu1 %v3406_v41  ;;  %2450 = vmatprep.subr.bf16.mxu0 %v3782_v0 }
 0x1b6   : > { %1139 = vmatpush1.bf16.msra.mxu1 %v3410_v42  ;;  %2451 = vmatpush3.bf16.msra.mxu0 %v3412_v43 }
 0x1b7   : > { %1140 = vmatprep.subr.bf16.mxu1 %v3416_v44  ;;  %2452 = vmatprep.subr.bf16.mxu0 %v3782_v0 }
 0x1ba   : > { %1141 = vmatpush1.bf16.msra.mxu1 %v3420_v45  ;;  %2453 = vmatpush3.bf16.msra.mxu0 %v3422_v46 }
 0x1bb   : > { %1142 = vmatprep.subr.bf16.mxu1 %v3426_v47  ;;  %2454 = vmatprep.subr.bf16.mxu0 %v3782_v0 }
 0x1be   : > { %1143 = vmatpush1.bf16.msra.mxu1 %v3430_v49  ;;  %2455 = vmatpush3.bf16.msra.mxu0 %v3432_v51  ;;  %v3440_v51 = vld [vmem:[#allocation5] sm:$0xff]  }
 0x1c1   : > { %1161 = vmatmul.mubr.bf16.vlgmr.msra.gmra.mrb[4].mxu1 %v753_v57  ;;  %2457 = vmatmul.mubr.bf16.vlgmr.msra.gmra.mrb[8].mxu0 %v753_v57 }
 0x1c2   : > { %1257 = vmatprep.mubr.bf16.mxu1 %v3790_v39  ;;  %1300 = vmatprep.mubr.bf16.mxu0 %v3790_v39 }
 0x274   : > { %v1076_v52 = vpop.f32.mrb[0].mxu1  ;;  %v1119_v53 = vpop.f32.mrb[4].mxu0 }
 0x275   : > { %v1078_v54 = vpop.f32.mrb[1].mxu1  ;;  %v1121_v48 = vpop.f32.mrb[5].mxu0 }
 0x276   : > { %v1080_v55 = vpop.f32.mrb[2].mxu1  ;;  %v1123_v46 = vpop.f32.mrb[6].mxu0 }
 0x277   : > { %v1212_v45 = vpack.c.bf16 %v1080_v55, %v1076_v52  ;;  %v1214_v47 = vpack.c.bf16 %v1123_v46, %v1119_v53  ;;  %v1082_v44 = vpop.f32.mrb[3].mxu1  ;;  %v1125_v0 = vpop.f32.mrb[7].mxu0 }
 0x278   : > { %v1213_v43 = vpack.c.bf16 %v1082_v44, %v1078_v54  ;;  %v1215_v49 = vpack.c.bf16 %v1125_v0, %v1121_v48  ;;  %v625_v54 = vld [vmem:[%s3758_s8] sm:$0x3] }
 0x27a   : > { %1225 = vmatprep.subr.bf16.mxu1 %v1213_v43  ;;  %1268 = vmatprep.subr.bf16.mxu0 %v1215_v49  ;;  %v1324_v49 = vlaneseq }
 0x27b   : > { %1226 = vmatpush1.bf16.msra.mxu1 %v1212_v45  ;;  %1269 = vmatpush1.bf16.msra.mxu0 %v1214_v47  ;;  %v3862_v47 = vmov 0.0  }
 0x27c   : > { %1438 = vmatprep.subr.bf16.mxu1 %v3242_v6  ;;  %1481 = vmatprep.subr.bf16.mxu0 %v3244_v7  ;;  %v1325_v52 = vshrl.u32 %v1324_v49, 7 }
 0x27e   : > { %2370 = vmatmul.mubr.msk.bf16.vlgmr.msra.gmra.mrb[8].mxu1 %vm1221_vm4, %v3440_v51  ;;  %2371 = vmatmul.mubr.msk.bf16.vlgmr.msra.gmra.mrb[12].mxu0 %vm1221_vm4, %v3440_v51  ;;  %v1330_v53 = vsub.s32 1, %v1325_v52 }
 0x27f   : > { %1439 = vmatpush1.bf16.msra.mxu1 %v3248_v9  ;;  %1482 = vmatpush1.bf16.msra.mxu0 %v3246_v8 }
 0x280   : > { %1440 = vmatprep.subr.bf16.mxu1 %v3254_v10  ;;  %1483 = vmatprep.subr.bf16.mxu0 %v3256_v11 }
 0x281   : > { %1470 = vmatprep.mubr.bf16.mxu1 %v3790_v39  ;;  %1513 = vmatprep.mubr.bf16.mxu0 %v3790_v39 }
 0x283   : > { %1441 = vmatpush1.bf16.msra.mxu1 %v3260_v13  ;;  %1484 = vmatpush1.bf16.msra.mxu0 %v3258_v12 }
 0x284   : > { %1442 = vmatprep.subr.bf16.mxu1 %v3266_v14  ;;  %1485 = vmatprep.subr.bf16.mxu0 %v3268_v15 }
 0x287   : > { %1443 = vmatpush1.bf16.msra.mxu1 %v3272_v17  ;;  %1486 = vmatpush1.bf16.msra.mxu0 %v3270_v16 }
 0x288   : > { %1444 = vmatprep.subr.bf16.mxu1 %v3278_v18  ;;  %1487 = vmatprep.subr.bf16.mxu0 %v3280_v19 }
 0x28b   : > { %1445 = vmatpush1.bf16.msra.mxu1 %v3284_v21  ;;  %1488 = vmatpush1.bf16.msra.mxu0 %v3282_v20 }
 0x28c   : > { %1446 = vmatprep.subr.bf16.mxu1 %v3290_v22  ;;  %1489 = vmatprep.subr.bf16.mxu0 %v3292_v23 }
 0x28f   : > { %1447 = vmatpush1.bf16.msra.mxu1 %v3296_v25  ;;  %1490 = vmatpush1.bf16.msra.mxu0 %v3294_v24 }
 0x290   : > { %1448 = vmatprep.subr.bf16.mxu1 %v3302_v26  ;;  %1491 = vmatprep.subr.bf16.mxu0 %v3304_v27 }
 0x293   : > { %1449 = vmatpush1.bf16.msra.mxu1 %v3308_v29  ;;  %1492 = vmatpush1.bf16.msra.mxu0 %v3306_v28 }
 0x294   : > { %v1162_v0 = vpop.f32.mrb[4].mxu1  ;;  %v3472_v55 = vpop.f32.mrb[8].mxu0  ;;  %1450 = vmatprep.subr.bf16.mxu1 %v3314_v30  ;;  %1493 = vmatprep.subr.bf16.mxu0 %v3316_v31 }
 0x295   : > { %v1164_v48 = vpop.f32.mrb[5].mxu1  ;;  %v2458_v57 = vpop.f32.mrb[9].mxu0 }
 0x296   : > { %v1166_v43 = vpop.f32.mrb[6].mxu1  ;;  %v3476_v44 = vpop.f32.mrb[10].mxu0  ;;  %v1326_v57 = vsub.s32 0, %v1325_v52 }
 0x297   : > { %v1168_v45 = vpop.f32.mrb[7].mxu1  ;;  %v2459_v46 = vpop.f32.mrb[11].mxu0  ;;  %1451 = vmatpush1.bf16.msra.mxu1 %v3320_v33  ;;  %1494 = vmatpush1.bf16.msra.mxu0 %v3318_v32 }
 0x298   : > { %1452 = vmatprep.subr.bf16.mxu1 %v3326_v34  ;;  %1495 = vmatprep.subr.bf16.mxu0 %v3328_v35  ;;  %v3489_v46 = vrot.slane %v625_v54, %v1330_v53  ;;  %v3491_v34 = vrot.slane %v625_v54, %v1326_v57 }
 0x29a   : > { %3863 = vst [vmem:[#allocation41_spill] sm:$0xff] %v3489_v46  ;;  %3864 = vst [vmem:[#allocation42_spill] sm:$0xff] %v3491_v34 }
 0x29b   : > { %1453 = vmatpush1.bf16.msra.mxu1 %v3332_v37  ;;  %1496 = vmatpush1.bf16.msra.mxu0 %v3330_v36 }
 0x29c   : > { %1524 = vmatprep.subr.bf16.mxu1 %v3336_v38  ;;  %2460 = vmatprep.subr.bf16.mxu0 %v3862_v47 }
 0x351   : > { %v1259_v39 = vpop.f32.mrb[8].mxu1  ;;  %v1302_v35 = vpop.f32.mrb[12].mxu0 }
 0x352   : > { %v1320_v37 = vadd.f32 %v1302_v35, %v1164_v48  ;;  %v1261_v36 = vpop.f32.mrb[9].mxu1  ;;  %v1304_v32 = vpop.f32.mrb[13].mxu0 }
 0x353   : > { %v1319_v38 = vadd.f32 %v1261_v36, %v1162_v0  ;;  %v1263_v33 = vpop.f32.mrb[10].mxu1  ;;  %v1306_v31 = vpop.f32.mrb[14].mxu0 }
 0x354   : > { %v1335_v49 = vadd.f32 %v3489_v46, %v1320_v37  ;;  %v1322_v30 = vadd.f32 %v1306_v31, %v1168_v45  ;;  %v1265_v28 = vpop.f32.mrb[11].mxu1  ;;  %v1308_v29 = vpop.f32.mrb[15].mxu0 }
 0x355   : > { %v1334_v27 = vadd.f32 %v3491_v34, %v1319_v38  ;;  %v1321_v52 = vadd.f32 %v1265_v28, %v1166_v43 }
 0x356   : > { %v2374_v53 = vmul.f32 -1.442695, %v1335_v49  ;;  %v1337_v26 = vadd.f32 %v3489_v46, %v1322_v30 }
 0x357   : > { %v2373_v24 = vmul.f32 -1.442695, %v1334_v27  ;;  %v1336_v54 = vadd.f32 %v3491_v34, %v1321_v52  ;;  %v3510_v27 = vld [vmem:[%s3868_s14] ss:$0 sm:$0xff] }
 0x358   : > { %2673 = vpow2.f32 %v2374_v53  ;;  %v2376_v35 = vmul.f32 -1.442695, %v1337_v26  ;;  %v3500_v26 = vld [vmem:[%s3757_s7] ss:$0 sm:$0xff] }
 0x359   : > { %2675 = vpow2.f32 %v2373_v24  ;;  %v2375_v36 = vmul.f32 -1.442695, %v1336_v54  ;;  %3865 = vst [vmem:[#allocation43_spill] sm:$0xff] %v3500_v26  ;;  %v3505_v24 = vld [vmem:[%s3866_s29] ss:$0 sm:$0xff]  ;;  %v1317_v30 = vadd.f32 %v3500_v26, %v1259_v39  ;;  %v1318_v54 = vadd.f32 %v3500_v26, %v1263_v33  ;;  %s2401_s29 = sshll.u32 %s3048_s22, 8 }
 0x35a   : > { %2677 = vpow2.f32 %v2376_v35  ;;  %3867 = vst [vmem:[#allocation44_spill] sm:$0xff] %v3505_v24  ;;  %v1376_v49 = vadd.f32 %v3505_v24, %v1304_v32  ;;  %s2177_s22 = scalar_lea.sflag [#allocation4], %s3220_s27 }
 0x35b   : > { %2679 = vpow2.f32 %v2375_v36  ;;  %v1368_v36 = vadd.f32 %v3510_v27, %v3472_v55 }
 0x362   : > { %v2674_v0 = vpop.eup %2673 }
 0x363   : > { %v2676_v37 = vpop.eup %2675  ;;  %v1351_v31 = vadd.f32 1.0, %v2674_v0 }
 0x364   : > { %v2678_v48 = vpop.eup %2677  ;;  %v1350_v45 = vadd.f32 1.0, %v2676_v37  ;;  %v1377_v37 = vadd.f32 %v3505_v24, %v1308_v29 }
 0x365   : > { %v2680_v57 = vpop.eup %2679  ;;  %2681 = vrcp.f32 %v1351_v31  ;;  %v1353_v28 = vadd.f32 1.0, %v2678_v48 }
 0x366   : > { %2683 = vrcp.f32 %v1350_v45  ;;  %v1352_v38 = vadd.f32 1.0, %v2680_v57  ;;  %v1369_v45 = vadd.f32 %v3510_v27, %v3476_v44 }
 0x367   : > { %2685 = vrcp.f32 %v1353_v28 }
 0x368   : > { %2687 = vrcp.f32 %v1352_v38 }
 0x36f   : > { %v2682_v43 = vpop.eup %2681 }
 0x370   : > { %v2684_v52 = vpop.eup %2683  ;;  %v1388_v53 = vmul.f32 %v2682_v43, %v1317_v30  ;;  %v1384_v28 = vsub.f32 1.0, %v2682_v43 }
 0x371   : > { %v2686_v35 = vpop.eup %2685  ;;  %v1378_v0 = vmul.f32 %v2684_v52, %v1376_v49 }
 0x372   : > { %v2688_v31 = vpop.eup %2687  ;;  %v1389_v48 = vmul.f32 %v2686_v35, %v1318_v54  ;;  %v1385_v30 = vsub.f32 1.0, %v2686_v35 }
 0x373   : > { %v1380_v39 = vadd.f32 %v1378_v0, %v1368_v36  ;;  %v1379_v57 = vmul.f32 %v2688_v31, %v1377_v37 }
 0x375   : > { %2689 = vtanh.f32 %v1380_v39  ;;  %v1381_v32 = vadd.f32 %v1379_v57, %v1369_v45 }
 0x377   : > { %2691 = vtanh.f32 %v1381_v32 }
 0x37f   : > { %v2690_v38 = vpop.eup %2689 }
 0x380   : > { %v1386_v33 = vmul.f32 %v2690_v38, %v1384_v28 }
 0x381   : > { %v2692_v26 = vpop.eup %2691 }
 0x382   : > { %v1390_v34 = vadd.f32 %v1388_v53, %v1386_v33  ;;  %v1387_v55 = vmul.f32 %v2692_v26, %v1385_v30 }
 0x384   : > { %v1391_v49 = vadd.f32 %v1389_v48, %v1387_v55  ;;  %v1392_v52 = vmul.f32 %v1390_v34, %v1390_v34 }
 0x386   : > { %v1393_v29 = vmul.f32 %v1391_v49, %v1391_v49  ;;  %v1394_v24 = vadd.f32 %v1391_v49, %v1390_v34 }
 0x388   : > { %v1395_v54 = vrot.slane %v1394_v24, 4  ;;  %v1401_v46 = vadd.f32 %v1393_v29, %v1392_v52  ;;  %v3528_v52 = vld [vmem:[%s3870_s10] ss:$0 sm:$0xff]  ;;  %s3704_s10 = scalar_lea.hbm %s3902_s28, %s2401_s29 }
 0x38a   : > { %v1402_v25 = vrot.slane %v1401_v46, 4  ;;  %v1396_v44 = vadd.f32 %v1395_v54, %v1394_v24 }
 0x38c   : > { %v1403_v36 = vadd.f32 %v1402_v25, %v1401_v46  ;;  %v1397_v0 = vrot.slane %v1396_v44, 2  ;;  %v3523_v25 = vld [vmem:[%s3869_s15] ss:$0 sm:$0xff] }
 0x38e   : > { %v1404_v37 = vrot.slane %v1403_v36, 2  ;;  %v1398_v31 = vadd.f32 %v1397_v0, %v1396_v44  ;;  %v3872_v0 = vld [vmem:[#allocation34_spill] sm:$0xff] }
 0x390   : > { %v1405_v45 = vadd.f32 %v1404_v37, %v1403_v36  ;;  %v1399_v43 = vrot.slane %v1398_v31, 1  ;;  %v3871_v36 = vmov 0   ;;  %v3873_v37 = vld [vmem:[#allocation35_spill] sm:$0xff] }
 0x392   : > { %v1400_v39 = vadd.f32 %v1399_v43, %v1398_v31  ;;  %v1406_v57 = vrot.slane %v1405_v45, 1  ;;  %v3874_v31 = vld [vmem:[#allocation36_spill] sm:$0xff]  ;;  %v3876_v43 = vld [vmem:[#allocation38_spill] sm:$0xff] }
 0x394   : > { %v1407_v35 = vadd.f32 %v1406_v57, %v1405_v45  ;;  %v1408_v32 = vmul.f32 0.0625, %v1400_v39  ;;  %v3875_v45 = vld [vmem:[#allocation37_spill] sm:$0xff]  ;;  %v3877_v39 = vld [vmem:[#allocation39_spill] sm:$0xff]  ;;  %v3878_v57 = vld [vmem:[#allocation40_spill] sm:$0xff] }
 0x396   : > { %v1409_v53 = vmul.f32 0.0625, %v1407_v35  ;;  %v1410_v26 = vmul.f32 %v1408_v32, %v1408_v32  ;;  %v1413_v48 = vsub.f32 %v1390_v34, %v1408_v32  ;;  %v1414_v28 = vsub.f32 %v1391_v49, %v1408_v32 }
 0x398   : > { %v1411_v38 = vsub.f32 %v1409_v53, %v1410_v26 }
 0x39a   : > { %v1412_v33 = vmax.f32 %v1411_v38, 0.0 }
 0x39c   : > { %v1415_v30 = vadd.f32 1e-05, %v1412_v33 }
 0x39e   : > { %2693 = vrsqrt.f32 %v1415_v30 }
 0x3a8   : > { %v2694_v55 = vpop.eup %2693 }
 0x3a9   : > { %v1417_v46 = vmul.f32 %v2694_v55, %v1413_v48  ;;  %v1418_v24 = vmul.f32 %v2694_v55, %v1414_v28 }
 0x3ab   : > { %v1425_v34 = vmul.f32 %v3523_v25, %v1417_v46  ;;  %v1426_v49 = vmul.f32 %v3523_v25, %v1418_v24 }
 0x3ad   : > { %v3533_v29 = vadd.f32 %v3528_v52, %v1425_v34  ;;  %v3536_v54 = vadd.f32 %v3528_v52, %v1426_v49  ;;  %v3889_v34 = vld [vmem:[#allocation27_spill] sm:$0xff]  ;;  %v3890_v49 = vld [vmem:[#allocation28_spill] sm:$0xff] }
 0x3af   : > { %v1437_v44 = vpack.c.bf16 %v3536_v54, %v3533_v29 }
 0x3b1   : > { %1471 = vmatmul.mubr.bf16.vlgmr.msra.gmra.mrb[12].mxu1 %v1437_v44  ;;  %1514 = vmatmul.mubr.bf16.vlgmr.msra.gmra.mrb[16].mxu0 %v1437_v44 }
 0x3b2   : > { %1525 = vmatpush1.bf16.msra.mxu1 %v3357_v50  ;;  %2461 = vmatpush3.bf16.msra.mxu0 %v3359_v56 }
 0x3b3   : > { %1526 = vmatprep.subr.bf16.mxu1 %v3363_v58  ;;  %2462 = vmatprep.subr.bf16.mxu0 %v3862_v47 }
 0x3b4   : > { %1556 = vmatprep.mubr.bf16.mxu1 %v3871_v36  ;;  %2476 = vmatprep.mubr.msk.bf16.mxu0 %vm2942_vm0, %v3862_v47 }
 0x3b6   : > { %1527 = vmatpush1.bf16.msra.mxu1 %v3367_v59  ;;  %2463 = vmatpush3.bf16.msra.mxu0 %v3369_v60 }
 0x3b7   : > { %1528 = vmatprep.subr.bf16.mxu1 %v3373_v61  ;;  %2464 = vmatprep.subr.bf16.mxu0 %v3862_v47 }
 0x3ba   : > { %1529 = vmatpush1.bf16.msra.mxu1 %v3380_v62  ;;  %2465 = vmatpush3.bf16.msra.mxu0 %v3382_v63 }
 0x3bb   : > { %1530 = vmatprep.subr.bf16.mxu1 %v3386_v1  ;;  %2466 = vmatprep.subr.bf16.mxu0 %v3862_v47 }
 0x3be   : > { %1531 = vmatpush1.bf16.msra.mxu1 %v3390_v2  ;;  %2467 = vmatpush3.bf16.msra.mxu0 %v3392_v3 }
 0x3bf   : > { %1532 = vmatprep.subr.bf16.mxu1 %v3396_v4  ;;  %2468 = vmatprep.subr.bf16.mxu0 %v3862_v47 }
 0x3c2   : > { %1533 = vmatpush1.bf16.msra.mxu1 %v3400_v5  ;;  %2469 = vmatpush3.bf16.msra.mxu0 %v3402_v40 }
 0x3c3   : > { %1534 = vmatprep.subr.bf16.mxu1 %v3406_v41  ;;  %2470 = vmatprep.subr.bf16.mxu0 %v3862_v47 }
 0x3c6   : > { %1535 = vmatpush1.bf16.msra.mxu1 %v3410_v42  ;;  %2471 = vmatpush3.bf16.msra.mxu0 %v3872_v0 }
 0x3c7   : > { %1536 = vmatprep.subr.bf16.mxu1 %v3873_v37  ;;  %2472 = vmatprep.subr.bf16.mxu0 %v3862_v47 }
 0x3ca   : > { %1537 = vmatpush1.bf16.msra.mxu1 %v3874_v31  ;;  %2473 = vmatpush3.bf16.msra.mxu0 %v3875_v45 }
 0x3cb   : > { %1538 = vmatprep.subr.bf16.mxu1 %v3876_v43  ;;  %2474 = vmatprep.subr.bf16.mxu0 %v3862_v47 }
 0x3ce   : > { %1539 = vmatpush1.bf16.msra.mxu1 %v3877_v39  ;;  %2475 = vmatpush3.bf16.msra.mxu0 %v3878_v57 }
 0x3d1   : > { %1557 = vmatmul.mubr.bf16.vlgmr.msra.gmra.mrb[16].mxu1 %v1437_v44  ;;  %2477 = vmatmul.mubr.bf16.vlgmr.msra.gmra.mrb[20].mxu0 %v1437_v44  ;;  %v3891_v44 = vld [vmem:[#allocation30_spill] sm:$0xff] }
 0x3d2   : > { %1644 = vmatprep.mubr.bf16.mxu1 %v3871_v36  ;;  %1687 = vmatprep.mubr.bf16.mxu0 %v3871_v36 }
 0x484   : > { %v1472_v35 = vpop.f32.mrb[12].mxu1  ;;  %v1515_v32 = vpop.f32.mrb[16].mxu0 }
 0x485   : > { %v1474_v53 = vpop.f32.mrb[13].mxu1  ;;  %v1517_v26 = vpop.f32.mrb[17].mxu0 }
 0x486   : > { %v1476_v48 = vpop.f32.mrb[14].mxu1  ;;  %v1519_v28 = vpop.f32.mrb[18].mxu0 }
 0x487   : > { %v1608_v38 = vpack.c.bf16 %v1476_v48, %v1472_v35  ;;  %v1610_v33 = vpack.c.bf16 %v1519_v28, %v1515_v32  ;;  %v1478_v30 = vpop.f32.mrb[15].mxu1  ;;  %v1521_v55 = vpop.f32.mrb[19].mxu0  ;;  %v3892_v35 = vld [vmem:[#allocation29_spill] sm:$0xff]  ;;  %v3893_v32 = vld [vmem:[#allocation31_spill] sm:$0xff] }
 0x488   : > { %v1609_v46 = vpack.c.bf16 %v1478_v30, %v1474_v53  ;;  %v1611_v24 = vpack.c.bf16 %v1521_v55, %v1517_v26 }
 0x48a   : > { %1612 = vmatprep.subr.bf16.mxu1 %v1609_v46  ;;  %1655 = vmatprep.subr.bf16.mxu0 %v1611_v24  ;;  %v3894_v46 = vld [vmem:[#allocation41_spill] sm:$0xff] }
 0x48b   : > { %1613 = vmatpush1.bf16.msra.mxu1 %v1608_v38  ;;  %1656 = vmatpush1.bf16.msra.mxu0 %v1610_v33 }
 0x48c   : > { %1784 = vmatprep.subr.bf16.mxu1 %v3242_v6  ;;  %1827 = vmatprep.subr.bf16.mxu0 %v3244_v7  ;;  %v3879_v6 = vld [vmem:[#allocation18_spill] sm:$0xff]  ;;  %v3880_v7 = vld [vmem:[#allocation17_spill] sm:$0xff] }
 0x48e   : > { %2381 = vmatmul.mubr.msk.bf16.vlgmr.msra.gmra.mrb[20].mxu1 %vm1221_vm4, %v3440_v51  ;;  %2382 = vmatmul.mubr.msk.bf16.vlgmr.msra.gmra.mrb[24].mxu0 %vm1221_vm4, %v3440_v51 }
 0x48f   : > { %1785 = vmatpush1.bf16.msra.mxu1 %v3248_v9  ;;  %1828 = vmatpush1.bf16.msra.mxu0 %v3246_v8  ;;  %v3881_v8 = vld [vmem:[#allocation19_spill] sm:$0xff]  ;;  %v3882_v9 = vld [vmem:[#allocation20_spill] sm:$0xff] }
 0x490   : > { %1786 = vmatprep.subr.bf16.mxu1 %v3254_v10  ;;  %1829 = vmatprep.subr.bf16.mxu0 %v3256_v11  ;;  %v3883_v10 = vld [vmem:[#allocation22_spill] sm:$0xff]  ;;  %v3884_v11 = vld [vmem:[#allocation21_spill] sm:$0xff] }
 0x491   : > { %1816 = vmatprep.mubr.bf16.mxu1 %v3871_v36  ;;  %1859 = vmatprep.mubr.bf16.mxu0 %v3871_v36 }
 0x493   : > { %1787 = vmatpush1.bf16.msra.mxu1 %v3260_v13  ;;  %1830 = vmatpush1.bf16.msra.mxu0 %v3258_v12 }
 0x494   : > { %1788 = vmatprep.subr.bf16.mxu1 %v3266_v14  ;;  %1831 = vmatprep.subr.bf16.mxu0 %v3268_v15  ;;  %v3885_v14 = vld [vmem:[#allocation23_spill] sm:$0xff]  ;;  %v3886_v15 = vld [vmem:[#allocation24_spill] sm:$0xff] }
 0x497   : > { %1789 = vmatpush1.bf16.msra.mxu1 %v3272_v17  ;;  %1832 = vmatpush1.bf16.msra.mxu0 %v3270_v16 }
 0x498   : > { %1790 = vmatprep.subr.bf16.mxu1 %v3278_v18  ;;  %1833 = vmatprep.subr.bf16.mxu0 %v3280_v19 }
 0x49b   : > { %1791 = vmatpush1.bf16.msra.mxu1 %v3284_v21  ;;  %1834 = vmatpush1.bf16.msra.mxu0 %v3282_v20 }
 0x49c   : > { %1792 = vmatprep.subr.bf16.mxu1 %v3290_v22  ;;  %1835 = vmatprep.subr.bf16.mxu0 %v3292_v23  ;;  %v3887_v22 = vld [vmem:[#allocation26_spill] sm:$0xff]  ;;  %v3888_v23 = vld [vmem:[#allocation25_spill] sm:$0xff] }
 0x49f   : > { %1793 = vmatpush1.bf16.msra.mxu1 %v3879_v6  ;;  %1836 = vmatpush1.bf16.msra.mxu0 %v3880_v7 }
 0x4a0   : > { %1794 = vmatprep.subr.bf16.mxu1 %v3881_v8  ;;  %1837 = vmatprep.subr.bf16.mxu0 %v3882_v9  ;;  %v3895_v9 = vld [vmem:[#allocation42_spill] sm:$0xff] }
 0x4a3   : > { %1795 = vmatpush1.bf16.msra.mxu1 %v3883_v10  ;;  %1838 = vmatpush1.bf16.msra.mxu0 %v3884_v11 }
 0x4a4   : > { %v1558_v12 = vpop.f32.mrb[16].mxu1  ;;  %v1601_v13 = vpop.f32.mrb[20].mxu0  ;;  %1796 = vmatprep.subr.bf16.mxu1 %v3885_v14  ;;  %1839 = vmatprep.subr.bf16.mxu0 %v3886_v15 }
 0x4a5   : > { %v1560_v16 = vpop.f32.mrb[17].mxu1  ;;  %v2478_v17 = vpop.f32.mrb[21].mxu0 }
 0x4a6   : > { %v1562_v18 = vpop.f32.mrb[18].mxu1  ;;  %v1604_v19 = vpop.f32.mrb[22].mxu0 }
 0x4a7   : > { %v1564_v20 = vpop.f32.mrb[19].mxu1  ;;  %v2479_v21 = vpop.f32.mrb[23].mxu0  ;;  %1797 = vmatpush1.bf16.msra.mxu1 %v3887_v22  ;;  %1840 = vmatpush1.bf16.msra.mxu0 %v3888_v23 }
 0x4a8   : > { %1798 = vmatprep.subr.bf16.mxu1 %v3889_v34  ;;  %1841 = vmatprep.subr.bf16.mxu0 %v3890_v49 }
 0x4ab   : > { %1799 = vmatpush1.bf16.msra.mxu1 %v3891_v44  ;;  %1842 = vmatpush1.bf16.msra.mxu0 %v3892_v35 }
 0x4ac   : > { %1870 = vmatprep.subr.bf16.mxu1 %v3893_v32  ;;  %2480 = vmatprep.subr.bf16.mxu0 %v3862_v47  ;;  %v3896_v32 = vld [vmem:[#allocation43_spill] sm:$0xff] }
 0x561   : > { %v1646_v53 = vpop.f32.mrb[20].mxu1  ;;  %v1689_v26 = vpop.f32.mrb[24].mxu0 }
 0x562   : > { %v1701_v48 = vadd.f32 %v1689_v26, %v1560_v16  ;;  %v1648_v28 = vpop.f32.mrb[21].mxu1  ;;  %v1691_v38 = vpop.f32.mrb[25].mxu0  ;;  %v1698_v26 = vadd.f32 %v3896_v32, %v1646_v53 }
 0x563   : > { %v1700_v33 = vadd.f32 %v1648_v28, %v1558_v12  ;;  %v1650_v30 = vpop.f32.mrb[22].mxu1  ;;  %v1693_v55 = vpop.f32.mrb[26].mxu0  ;;  %v3897_v28 = vld [vmem:[#allocation44_spill] sm:$0xff] }
 0x564   : > { %v1705_v24 = vadd.f32 %v1701_v48, %v3894_v46  ;;  %v1703_v6 = vadd.f32 %v1693_v55, %v1564_v20  ;;  %v1652_v7 = vpop.f32.mrb[23].mxu1  ;;  %v1695_v8 = vpop.f32.mrb[27].mxu0 }
 0x565   : > { %v1704_v10 = vadd.f32 %v1700_v33, %v3895_v9  ;;  %v1702_v11 = vadd.f32 %v1652_v7, %v1562_v18  ;;  %v1734_v33 = vadd.f32 %v3897_v28, %v1691_v38 }
 0x566   : > { %v2384_v14 = vmul.f32 -1.442695, %v1705_v24  ;;  %v1707_v15 = vadd.f32 %v1703_v6, %v3894_v46  ;;  %v1699_v6 = vadd.f32 %v3896_v32, %v1650_v30 }
 0x567   : > { %v2383_v17 = vmul.f32 -1.442695, %v1704_v10  ;;  %v1706_v21 = vadd.f32 %v1702_v11, %v3895_v9  ;;  %v1732_v10 = vadd.f32 %v3510_v27, %v1601_v13 }
 0x568   : > { %2695 = vpow2.f32 %v2384_v14  ;;  %v2386_v16 = vmul.f32 -1.442695, %v1707_v15  ;;  %v1735_v14 = vadd.f32 %v3897_v28, %v1695_v8 }
 0x569   : > { %2697 = vpow2.f32 %v2383_v17  ;;  %v2385_v12 = vmul.f32 -1.442695, %v1706_v21  ;;  %v1733_v21 = vadd.f32 %v3510_v27, %v1604_v19 }
 0x56a   : > { %2699 = vpow2.f32 %v2386_v16 }
 0x56b   : > { %2701 = vpow2.f32 %v2385_v12 }
 0x572   : > { %v2696_v22 = vpop.eup %2695 }
 0x573   : > { %v2698_v23 = vpop.eup %2697  ;;  %v1721_v20 = vadd.f32 1.0, %v2696_v22 }
 0x574   : > { %v2700_v34 = vpop.eup %2699  ;;  %v1720_v49 = vadd.f32 1.0, %v2698_v23 }
 0x575   : > { %v2702_v44 = vpop.eup %2701  ;;  %2703 = vrcp.f32 %v1721_v20  ;;  %v1723_v18 = vadd.f32 1.0, %v2700_v34 }
 0x576   : > { %2705 = vrcp.f32 %v1720_v49  ;;  %v1722_v35 = vadd.f32 1.0, %v2702_v44 }
 0x577   : > { %2707 = vrcp.f32 %v1723_v18 }
 0x578   : > { %2709 = vrcp.f32 %v1722_v35 }
 0x57f   : > { %v2704_v48 = vpop.eup %2703 }
 0x580   : > { %v2706_v55 = vpop.eup %2705  ;;  %v1746_v24 = vmul.f32 %v2704_v48, %v1698_v26  ;;  %v1742_v38 = vsub.f32 1.0, %v2704_v48 }
 0x581   : > { %v2708_v7 = vpop.eup %2707  ;;  %v1736_v11 = vmul.f32 %v2706_v55, %v1734_v33 }
 0x582   : > { %v2710_v15 = vpop.eup %2709  ;;  %v1747_v17 = vmul.f32 %v2708_v7, %v1699_v6  ;;  %v1743_v20 = vsub.f32 1.0, %v2708_v7 }
 0x583   : > { %v1738_v16 = vadd.f32 %v1736_v11, %v1732_v10  ;;  %v1737_v12 = vmul.f32 %v2710_v15, %v1735_v14 }
 0x585   : > { %2711 = vtanh.f32 %v1738_v16  ;;  %v1739_v53 = vadd.f32 %v1737_v12, %v1733_v21 }
 0x587   : > { %2713 = vtanh.f32 %v1739_v53 }
 0x58f   : > { %v2712_v22 = vpop.eup %2711 }
 0x590   : > { %v1744_v23 = vmul.f32 %v2712_v22, %v1742_v38 }
 0x591   : > { %v2714_v30 = vpop.eup %2713 }
 0x592   : > { %v1748_v34 = vadd.f32 %v1746_v24, %v1744_v23  ;;  %v1745_v49 = vmul.f32 %v2714_v30, %v1743_v20 }
 0x594   : > { %v1749_v13 = vadd.f32 %v1747_v17, %v1745_v49  ;;  %v1750_v44 = vmul.f32 %v1748_v34, %v1748_v34 }
 0x596   : > { %v1751_v18 = vmul.f32 %v1749_v13, %v1749_v13  ;;  %v1752_v8 = vadd.f32 %v1749_v13, %v1748_v34 }
 0x598   : > { %v1753_v35 = vrot.slane %v1752_v8, 4  ;;  %v1759_v26 = vadd.f32 %v1751_v18, %v1750_v44 }
 0x59a   : > { %v1760_v33 = vrot.slane %v1759_v26, 4  ;;  %v1754_v19 = vadd.f32 %v1753_v35, %v1752_v8  ;;  %v3898_v8 = vld [vmem:[#allocation32_spill] sm:$0xff] }
 0x59b   : > { %v1435_v35 = vmax.f32 %v3898_v8, %v3533_v29 }
 0x59c   : > { %v1761_v55 = vadd.f32 %v1760_v33, %v1759_v26  ;;  %v1755_v6 = vrot.slane %v1754_v19, 2  ;;  %v3899_v26 = vld [vmem:[#allocation33_spill] sm:$0xff] }
 0x59d   : > { %v1436_v33 = vmax.f32 %v3899_v26, %v3536_v54 }
 0x59e   : > { %v1762_v10 = vrot.slane %v1761_v55, 2  ;;  %v1756_v11 = vadd.f32 %v1755_v6, %v1754_v19 }
 0x5a0   : > { %v1763_v14 = vadd.f32 %v1762_v10, %v1761_v55  ;;  %v1757_v48 = vrot.slane %v1756_v11, 1 }
 0x5a2   : > { %v1758_v15 = vadd.f32 %v1757_v48, %v1756_v11  ;;  %v1764_v21 = vrot.slane %v1763_v14, 1 }
 0x5a4   : > { %v1765_v7 = vadd.f32 %v1764_v21, %v1763_v14  ;;  %v1766_v16 = vmul.f32 0.0625, %v1758_v15 }
 0x5a6   : > { %v1767_v24 = vmul.f32 0.0625, %v1765_v7  ;;  %v1768_v12 = vmul.f32 %v1766_v16, %v1766_v16  ;;  %v1771_v17 = vsub.f32 %v1748_v34, %v1766_v16  ;;  %v1772_v53 = vsub.f32 %v1749_v13, %v1766_v16 }
 0x5a8   : > { %v1769_v38 = vsub.f32 %v1767_v24, %v1768_v12 }
 0x5aa   : > { %v1770_v22 = vmax.f32 %v1769_v38, 0.0 }
 0x5ac   : > { %v1773_v23 = vadd.f32 1e-05, %v1770_v22 }
 0x5ae   : > { %2715 = vrsqrt.f32 %v1773_v23 }
 0x5b8   : > { %v2716_v20 = vpop.eup %2715 }
 0x5b9   : > { %v1775_v30 = vmul.f32 %v2716_v20, %v1771_v17  ;;  %v1776_v49 = vmul.f32 %v2716_v20, %v1772_v53 }
 0x5bb   : > { %v1777_v44 = vmul.f32 %v3523_v25, %v1775_v30  ;;  %v1778_v18 = vmul.f32 %v3523_v25, %v1776_v49 }
 0x5bd   : > { %v1779_v34 = vadd.f32 %v3528_v52, %v1777_v44  ;;  %v1780_v13 = vadd.f32 %v3528_v52, %v1778_v18 }
 0x5bf   : > { %v3633_v19 = vmax.f32 %v1435_v35, %v1779_v34  ;;  %v3635_v55 = vmax.f32 %v1436_v33, %v1780_v13  ;;  %v1783_v6 = vpack.c.bf16 %v1780_v13, %v1779_v34 }
 0x5c1   : > { %1817 = vmatmul.mubr.bf16.vlgmr.msra.gmra.mrb[24].mxu1 %v1783_v6  ;;  %1860 = vmatmul.mubr.bf16.vlgmr.msra.gmra.mrb[28].mxu0 %v1783_v6 }
 0x5c2   : > { %1871 = vmatpush1.bf16.msra.mxu1 %v3357_v50  ;;  %2481 = vmatpush3.bf16.msra.mxu0 %v3359_v56 }
 0x5c3   : > { %1872 = vmatprep.subr.bf16.mxu1 %v3363_v58  ;;  %2482 = vmatprep.subr.bf16.mxu0 %v3862_v47 }
 0x5c4   : > { %1902 = vmatprep.mubr.bf16.mxu1 %v3871_v36  ;;  %2496 = vmatprep.mubr.msk.bf16.mxu0 %vm2942_vm0, %v3862_v47 }
 0x5c6   : > { %1873 = vmatpush1.bf16.msra.mxu1 %v3367_v59  ;;  %2483 = vmatpush3.bf16.msra.mxu0 %v3369_v60 }
 0x5c7   : > { %1874 = vmatprep.subr.bf16.mxu1 %v3373_v61  ;;  %2484 = vmatprep.subr.bf16.mxu0 %v3862_v47 }
 0x5ca   : > { %1875 = vmatpush1.bf16.msra.mxu1 %v3380_v62  ;;  %2485 = vmatpush3.bf16.msra.mxu0 %v3382_v63 }
 0x5cb   : > { %1876 = vmatprep.subr.bf16.mxu1 %v3386_v1  ;;  %2486 = vmatprep.subr.bf16.mxu0 %v3862_v47 }
 0x5ce   : > { %1877 = vmatpush1.bf16.msra.mxu1 %v3390_v2  ;;  %2487 = vmatpush3.bf16.msra.mxu0 %v3392_v3 }
 0x5cf   : > { %1878 = vmatprep.subr.bf16.mxu1 %v3396_v4  ;;  %2488 = vmatprep.subr.bf16.mxu0 %v3862_v47 }
 0x5d2   : > { %1879 = vmatpush1.bf16.msra.mxu1 %v3400_v5  ;;  %2489 = vmatpush3.bf16.msra.mxu0 %v3402_v40 }
 0x5d3   : > { %1880 = vmatprep.subr.bf16.mxu1 %v3406_v41  ;;  %2490 = vmatprep.subr.bf16.mxu0 %v3862_v47 }
 0x5d6   : > { %1881 = vmatpush1.bf16.msra.mxu1 %v3410_v42  ;;  %2491 = vmatpush3.bf16.msra.mxu0 %v3872_v0 }
 0x5d7   : > { %1882 = vmatprep.subr.bf16.mxu1 %v3873_v37  ;;  %2492 = vmatprep.subr.bf16.mxu0 %v3862_v47 }
 0x5da   : > { %1883 = vmatpush1.bf16.msra.mxu1 %v3874_v31  ;;  %2493 = vmatpush3.bf16.msra.mxu0 %v3875_v45 }
 0x5db   : > { %1884 = vmatprep.subr.bf16.mxu1 %v3876_v43  ;;  %2494 = vmatprep.subr.bf16.mxu0 %v3862_v47 }
 0x5de   : > { %1885 = vmatpush1.bf16.msra.mxu1 %v3877_v39  ;;  %2495 = vmatpush3.bf16.msra.mxu0 %v3878_v57 }
 0x5e1   : > { %1903 = vmatmul.mubr.bf16.vlgmr.msra.gmra.mrb[28].mxu1 %v1783_v6  ;;  %2497 = vmatmul.mubr.bf16.vlgmr.msra.gmra.mrb[32].mxu0 %v1783_v6 }
 0x5e2   : > { %1990 = vmatprep.mubr.bf16.mxu1 %v3871_v36  ;;  %2033 = vmatprep.mubr.bf16.mxu0 %v3871_v36 }
 0x694   : > { %v1818_v50 = vpop.f32.mrb[24].mxu1  ;;  %v1861_v56 = vpop.f32.mrb[28].mxu0 }
 0x695   : > { %v1820_v58 = vpop.f32.mrb[25].mxu1  ;;  %v1863_v59 = vpop.f32.mrb[29].mxu0 }
 0x696   : > { %v1822_v60 = vpop.f32.mrb[26].mxu1  ;;  %v1865_v61 = vpop.f32.mrb[30].mxu0 }
 0x697   : > { %v1954_v62 = vpack.c.bf16 %v1822_v60, %v1818_v50  ;;  %v1956_v63 = vpack.c.bf16 %v1865_v61, %v1861_v56  ;;  %v1824_v1 = vpop.f32.mrb[27].mxu1  ;;  %v1867_v2 = vpop.f32.mrb[31].mxu0 }
 0x698   : > { %v1955_v3 = vpack.c.bf16 %v1824_v1, %v1820_v58  ;;  %v1957_v4 = vpack.c.bf16 %v1867_v2, %v1863_v59 }
 0x69a   : > { %1958 = vmatprep.subr.bf16.mxu1 %v1955_v3  ;;  %2001 = vmatprep.subr.bf16.mxu0 %v1957_v4 }
 0x69b   : > { %1959 = vmatpush1.bf16.msra.mxu1 %v1954_v62  ;;  %2002 = vmatpush1.bf16.msra.mxu0 %v1956_v63 }
 0x69e   : > { %2387 = vmatmul.mubr.msk.bf16.vlgmr.msra.gmra.mrb[32].mxu1 %vm1221_vm4, %v3440_v51  ;;  %2388 = vmatmul.mubr.msk.bf16.vlgmr.msra.gmra.mrb[36].mxu0 %vm1221_vm4, %v3440_v51 }
 0x6b4   : > { %v1904_v5 = vpop.f32.mrb[28].mxu1  ;;  %v1947_v40 = vpop.f32.mrb[32].mxu0 }
 0x6b5   : > { %v1906_v41 = vpop.f32.mrb[29].mxu1  ;;  %v2498_v42 = vpop.f32.mrb[33].mxu0  ;;  %v2078_v13 = vadd.f32 %v3510_v27, %v1947_v40 }
 0x6b6   : > { %v1908_v47 = vpop.f32.mrb[30].mxu1  ;;  %v1950_v29 = vpop.f32.mrb[34].mxu0 }
 0x6b7   : > { %v1910_v54 = vpop.f32.mrb[31].mxu1  ;;  %v2499_v36 = vpop.f32.mrb[35].mxu0  ;;  %v2079_v59 = vadd.f32 %v3510_v27, %v1950_v29 }
 0x771   : > { %v1992_v0 = vpop.f32.mrb[32].mxu1  ;;  %v2035_v37 = vpop.f32.mrb[36].mxu0 }
 0x772   : > { %v2047_v31 = vadd.f32 %v2035_v37, %v1906_v41  ;;  %v1994_v45 = vpop.f32.mrb[33].mxu1  ;;  %v2037_v43 = vpop.f32.mrb[37].mxu0 }
 0x773   : > { %v2046_v39 = vadd.f32 %v1994_v45, %v1904_v5  ;;  %v1996_v57 = vpop.f32.mrb[34].mxu1  ;;  %v2039_v10 = vpop.f32.mrb[38].mxu0  ;;  %v2080_v8 = vadd.f32 %v3897_v28, %v2037_v43 }
 0x774   : > { %v2051_v11 = vadd.f32 %v2047_v31, %v3894_v46  ;;  %v2049_v14 = vadd.f32 %v2039_v10, %v1910_v54  ;;  %v1998_v51 = vpop.f32.mrb[35].mxu1  ;;  %v2041_v48 = vpop.f32.mrb[39].mxu0  ;;  %v2045_v33 = vadd.f32 %v3896_v32, %v1996_v57 }
 0x775   : > { %v2050_v15 = vadd.f32 %v2046_v39, %v3895_v9  ;;  %v2048_v21 = vadd.f32 %v1998_v51, %v1908_v47  ;;  %v2081_v50 = vadd.f32 %v3897_v28, %v2041_v48 }
 0x776   : > { %v2390_v7 = vmul.f32 -1.442695, %v2051_v11  ;;  %v2053_v16 = vadd.f32 %v2049_v14, %v3894_v46  ;;  %v2044_v46 = vadd.f32 %v3896_v32, %v1992_v0 }
 0x777   : > { %v2389_v24 = vmul.f32 -1.442695, %v2050_v15  ;;  %v2052_v12 = vadd.f32 %v2048_v21, %v3895_v9 }
 0x778   : > { %2717 = vpow2.f32 %v2390_v7  ;;  %v2392_v17 = vmul.f32 -1.442695, %v2053_v16 }
 0x779   : > { %2719 = vpow2.f32 %v2389_v24  ;;  %v2391_v53 = vmul.f32 -1.442695, %v2052_v12 }
 0x77a   : > { %2721 = vpow2.f32 %v2392_v17 }
 0x77b   : > { %2723 = vpow2.f32 %v2391_v53 }
 0x782   : > { %v2718_v38 = vpop.eup %2717 }
 0x783   : > { %v2720_v22 = vpop.eup %2719  ;;  %v2067_v23 = vadd.f32 1.0, %v2718_v38 }
 0x784   : > { %v2722_v20 = vpop.eup %2721  ;;  %v2066_v30 = vadd.f32 1.0, %v2720_v22 }
 0x785   : > { %v2724_v49 = vpop.eup %2723  ;;  %2725 = vrcp.f32 %v2067_v23  ;;  %v2069_v44 = vadd.f32 1.0, %v2722_v20 }
 0x786   : > { %2727 = vrcp.f32 %v2066_v30  ;;  %v2068_v18 = vadd.f32 1.0, %v2724_v49 }
 0x787   : > { %2729 = vrcp.f32 %v2069_v44 }
 0x788   : > { %2731 = vrcp.f32 %v2068_v18 }
 0x78f   : > { %v2726_v9 = vpop.eup %2725 }
 0x790   : > { %v2728_v35 = vpop.eup %2727  ;;  %v2092_v26 = vmul.f32 %v2726_v9, %v2044_v46  ;;  %v2088_v63 = vsub.f32 1.0, %v2726_v9 }
 0x791   : > { %v2730_v34 = vpop.eup %2729  ;;  %v2082_v6 = vmul.f32 %v2728_v35, %v2080_v8 }
 0x792   : > { %v2732_v56 = vpop.eup %2731  ;;  %v2093_v58 = vmul.f32 %v2730_v34, %v2045_v33  ;;  %v2089_v3 = vsub.f32 1.0, %v2730_v34 }
 0x793   : > { %v2084_v60 = vadd.f32 %v2082_v6, %v2078_v13  ;;  %v2083_v61 = vmul.f32 %v2732_v56, %v2081_v50 }
 0x795   : > { %2733 = vtanh.f32 %v2084_v60  ;;  %v2085_v62 = vadd.f32 %v2083_v61, %v2079_v59 }
 0x797   : > { %2735 = vtanh.f32 %v2085_v62 }
 0x79f   : > { %v2734_v1 = vpop.eup %2733 }
 0x7a0   : > { %v2090_v2 = vmul.f32 %v2734_v1, %v2088_v63 }
 0x7a1   : > { %v2736_v32 = vpop.eup %2735 }
 0x7a2   : > { %v2094_v4 = vadd.f32 %v2092_v26, %v2090_v2  ;;  %v2091_v5 = vmul.f32 %v2736_v32, %v2089_v3  ;;  %v2393_v2 = vld [vmem:[%s3900_s30] ss:$0 sm:$0xff]  ;;  %s2861_s30 = scalar_lea.vmem %s2860_s11, 512 }
 0x7a3   : > { %p2863_p2 = scmp.lt.s32.totalorder %s2861_s30, %s2855_s23 }
 0x7a4   : > { %v2095_v40 = vadd.f32 %v2093_v58, %v2091_v5  ;;  %v2096_v41 = vmul.f32 %v2094_v4, %v2094_v4 }
 0x7a5   : > { %p2864_p1 = por %p2863_p2, %p2862_p12 }
 0x7a6   : > { %v2097_v42 = vmul.f32 %v2095_v40, %v2095_v40  ;;  %v2098_v28 = vadd.f32 %v2095_v40, %v2094_v4 }
 0x7a7   : > { %p2865_p4 = pnand %p2864_p1, %p2858_p7 }
 0x7a8   : > { %v2099_v47 = vrot.slane %v2098_v28, 4  ;;  %v2105_v54 = vadd.f32 %v2097_v42, %v2096_v41 }
 0x7aa   : > { %v2100_v36 = vadd.f32 %v2099_v47, %v2098_v28  ;;  %v2106_v27 = vrot.slane %v2105_v54, 4 }
 0x7ac   : > { %v2101_v29 = vrot.slane %v2100_v36, 2  ;;  %v2107_v0 = vadd.f32 %v2106_v27, %v2105_v54 }
 0x7ae   : > { %v2102_v37 = vadd.f32 %v2101_v29, %v2100_v36  ;;  %v2108_v31 = vrot.slane %v2107_v0, 2 }
 0x7b0   : > { %v2103_v45 = vrot.slane %v2102_v37, 1  ;;  %v2109_v43 = vadd.f32 %v2108_v31, %v2107_v0 }
 0x7b2   : > { %v2104_v39 = vadd.f32 %v2103_v45, %v2102_v37  ;;  %v2110_v57 = vrot.slane %v2109_v43, 1 }
 0x7b4   : > { %v2111_v10 = vadd.f32 %v2110_v57, %v2109_v43  ;;  %v2112_v11 = vmul.f32 0.0625, %v2104_v39 }
 0x7b6   : > { %v2113_v14 = vmul.f32 0.0625, %v2111_v10  ;;  %v2114_v51 = vmul.f32 %v2112_v11, %v2112_v11  ;;  %v2117_v48 = vsub.f32 %v2094_v4, %v2112_v11  ;;  %v2118_v15 = vsub.f32 %v2095_v40, %v2112_v11  ;;  %v2394_v4 = vld [vmem:[%s3901_s13] ss:$0 sm:$0xff] }
 0x7b8   : > { %v2115_v21 = vsub.f32 %v2113_v14, %v2114_v51 }
 0x7ba   : > { %v2116_v7 = vmax.f32 %v2115_v21, 0.0 }
 0x7bc   : > { %v2119_v16 = vadd.f32 1e-05, %v2116_v7 }
 0x7be   : > { %2737 = vrsqrt.f32 %v2119_v16 }
 0x7c8   : > { %v2738_v24 = vpop.eup %2737 }
 0x7c9   : > { %v2121_v12 = vmul.f32 %v2738_v24, %v2117_v48  ;;  %v2122_v17 = vmul.f32 %v2738_v24, %v2118_v15 }
 0x7cb   : > { %v2124_v53 = vmul.f32 %v3523_v25, %v2122_v17  ;;  %v2123_v38 = vmul.f32 %v3523_v25, %v2121_v12 }
 0x7cd   : > { %v2126_v22 = vadd.f32 %v3528_v52, %v2124_v53  ;;  %v2125_v23 = vadd.f32 %v3528_v52, %v2123_v38 }
 0x7cf   : > { %v2127_v20 = vmax.f32 %v3633_v19, %v2125_v23  ;;  %v2128_v30 = vmax.f32 %v3635_v55, %v2126_v22 }
 0x7d1   : > { %v2131_v49 = vmul.f32 %v2127_v20, %v2127_v20  ;;  %v2132_v44 = vmul.f32 %v2128_v30, %v2128_v30  ;;  %v2133_v18 = vadd.f32 %v2128_v30, %v2127_v20 }
 0x7d3   : > { %v2134_v46 = vrot.slane %v2133_v18, 4  ;;  %v2140_v9 = vadd.f32 %v2132_v44, %v2131_v49 }
 0x7d5   : > { %v2135_v8 = vadd.f32 %v2134_v46, %v2133_v18  ;;  %v2141_v35 = vrot.slane %v2140_v9, 4 }
 0x7d7   : > { %v2136_v26 = vrot.slane %v2135_v8, 2  ;;  %v2142_v33 = vadd.f32 %v2141_v35, %v2140_v9 }
 0x7d9   : > { %v2137_v34 = vadd.f32 %v2136_v26, %v2135_v8  ;;  %v2143_v13 = vrot.slane %v2142_v33, 2 }
 0x7db   : > { %v2138_v25 = vrot.slane %v2137_v34, 1  ;;  %v2144_v6 = vadd.f32 %v2143_v13, %v2142_v33 }
 0x7dd   : > { %v2139_v50 = vadd.f32 %v2138_v25, %v2137_v34  ;;  %v2145_v52 = vrot.slane %v2144_v6, 1 }
 0x7df   : > { %v2146_v19 = vadd.f32 %v2145_v52, %v2144_v6  ;;  %v2147_v56 = vmul.f32 0.0625, %v2139_v50 }
 0x7e1   : > { %v2148_v55 = vmul.f32 0.0625, %v2146_v19  ;;  %v2149_v58 = vmul.f32 %v2147_v56, %v2147_v56  ;;  %v2152_v59 = vsub.f32 %v2127_v20, %v2147_v56  ;;  %v2153_v60 = vsub.f32 %v2128_v30, %v2147_v56 }
 0x7e3   : > { %v2150_v61 = vsub.f32 %v2148_v55, %v2149_v58 }
 0x7e5   : > { %v2151_v62 = vmax.f32 %v2150_v61, 0.0 }
 0x7e7   : > { %v2154_v63 = vadd.f32 1e-05, %v2151_v62 }
 0x7e9   : > { %2739 = vrsqrt.f32 %v2154_v63 }
 0x7f3   : > { %v2740_v1 = vpop.eup %2739 }
 0x7f4   : > { %v2156_v3 = vmul.f32 %v2740_v1, %v2152_v59  ;;  %v2157_v32 = vmul.f32 %v2740_v1, %v2153_v60 }
 0x7f6   : > { %v2164_v5 = vmul.f32 %v2393_v2, %v2156_v3  ;;  %v2165_v40 = vmul.f32 %v2393_v2, %v2157_v32 }
 0x7f8   : > { %v2172_v41 = vadd.f32 %v2394_v4, %v2164_v5  ;;  %v2173_v42 = vadd.f32 %v2394_v4, %v2165_v40 }
 0x7fa   : > { %2174 = vst [vmem:[%s556_s24] sm:$0xff] %v2172_v41  ;;  %2175 = vst [vmem:[%s556_s24 + $0x8] sm:$0xff] %v2173_v42 }
 0x7fb   : > { %2868 = shalt.err (!%p2865_p4)
}
 0x7fc   : > { %s2869_s29 = scalar_lea.hbm %s3704_s10, 256  ;;  %s2873_s16 = scalar_lea.hbm %s3902_s28, 512 }
 0x7fd   : > { %p2870_p9 = scmp.ne.s32.totalorder %s3704_s10, %s2869_s29  ;;  %p2874_p8 = scmp.lt.u32.totalorder %s3704_s10, %s3902_s28 }
 0x7fe   : > { %p2875_p13 = scmp.lt.u32.totalorder %s2873_s16, %s2869_s29  ;;  %p2877_p10 = scmp.lt.u32.totalorder %s2869_s29, %s3704_s10 }
 0x7ff   : > { %p2871_p0 = pnand %p2870_p9, %p3172_p5 }
 0x800   : > { %p2876_p6 = por %p2875_p13, %p2874_p8 }
 0x801   : > { %p2872_p11 = pneg %p2871_p0 }
 0x802   : > { %p2878_p3 = por %p2877_p10, %p2876_p6 }
 0x804   : > { %p2879_p7 = pnand %p2878_p3, %p2872_p11 }
 0x806   : > { %2882 = shalt.err (!%p2879_p7)
}
 0x807   : > { %s2945_s17 = smov 128   ;;  %s2946_s23 = smov 8  }
 0x808   : > { %2514 = dma.vmem_to_hbm [thread:$0]  (%p3172_p5), %s3706_s26, 256, %s3704_s10, %s2177_s22, %s2945_s17, %s2945_s17, %s2946_s23  }
 0x809 PF: > { %s3903_s18 = sld [smem:[#allocation15_spill]]  ;;  %s3904_s11 = sld [smem:[#allocation16_spill]] }
 0x80a   : > { %p3906_p2 = scmp.ge.s32.totalorder %s2929_s21, 2 }
 0x80f   : > { %s2205_s30 = sand.u32 1, %s3903_s18   ;;  %p3905_p12 = scmp.ne.s32.totalorder %s3904_s11, 0 }
 0x810   : > { %s2206_s29 = scalar_lea.sflag [#allocation4], %s2205_s30 }
 0x811   : > { %p2531_p1 = pnand %p3906_p2, %p3905_p12 }
 0x813   : > { %2912 = dma.done.wait (!%p2531_p1), %s2206_s29, 256  }
 0x814   : > { %2914 = vsyncadd (!%p2531_p1), %s2206_s29, 4294967040  ;;  %p30_p4 = scmp.ge.s32.totalorder %s3158_s9, 4   ;;  %s3907_s18 = smov %s2921_s19 }
 0x815   : > { %s3908_s19 = smov %s2925_s20  ;;  %s3909_s20 = smov %s3168_s12 }
 0x816   : > { %s3910_s21 = smov %s3158_s9  ;;  %32 = sbr.rel (!%p30_p4) target bundleno = 15 (0xf), region = 137 }
 0x81d   :  { %2211 = vsyncpa [#allocation3], 1 }
 0x81e   :  { %2213 = vsyncpa [#allocation3 + $0x1], 1 }
 0x81f   :  { %2214 = vsyncpa [#allocation6], 1 }
 0x820   :  { %2215 = vsyncpa [#allocation9], 1 }
 0x821   :  { %2216 = vsyncpa [#allocation4], 1 }
 0x822   :  { %2218 = vsyncpa [#allocation4 + $0x1], 1 }

</bundles_post_ra>
